<compile_context>
chip_gen: v7x
topology: tpu7x:2x2x1
jax: 0.10.0
libtpu: 0.0.40
codegen_flags: <defaults>
</compile_context>

<pallas_src>
import jax
import jax.numpy as jnp
from jax.experimental import pallas as pl
from jax.experimental.pallas import tpu as pltpu  # noqa: F401  (imported per template)

BN_EPS = 1e-5  # PyTorch BatchNorm1d default eps


# ---------------------------------------------------------------------------
# Pallas kernel factory: full forward for the packed (3N, Din) batch
# ---------------------------------------------------------------------------
def _make_model_kernel(wmeta, vmeta, n_members, rows_per_member):
    """wmeta: name -> (row_off, d_in, d_out) into the weight slab.
       vmeta: name -> (lane_off, d) into the (1, total) vector slab."""

    def kernel(x_ref, adj_ref, w_ref, v_ref, out_ref):
        def W(name):
            off, din, dout = wmeta[name]
            return w_ref[off:off + din, 0:dout]          # static slice of VMEM ref

        def V(name):
            off, d = vmeta[name]
            return v_ref[:, off:off + d]                  # (1, d) static lane slice

        def dot(a, b):
            return jnp.dot(a, b, preferred_element_type=jnp.float32)

        def bn_relu(h, gname, bname):
            # Per-triplet-member batch statistics: reshape only for the reduction.
            d = h.shape[-1]
            h3 = h.reshape(n_members, rows_per_member, d)
            mean = jnp.mean(h3, axis=1, keepdims=True)                       # (3,1,d)
            var = jnp.maximum(
                jnp.mean(h3 * h3, axis=1, keepdims=True) - mean * mean, 0.0)  # (3,1,d)
            scale = V(gname) * jax.lax.rsqrt(var + BN_EPS)                   # gamma folded
            out3 = jnp.maximum((h3 - mean) * scale + V(bname), 0.0)
            return out3.reshape(h.shape)

        x = x_ref[...]          # (3N, Din)
        adj = adj_ref[...]      # (Din, Din)

        # ----- MLP trunk: Linear -> BN -> ReLU (x2); BN-cancelled biases dropped -----
        # TODO(synk): nn.Dropout(0.1) is stochastic in train mode; treated as identity.
        z1 = bn_relu(dot(x, W('w1')), 'gm1', 'bt1')
        z1 = bn_relu(dot(z1, W('w2')), 'gm2', 'bt2')

        # ----- graph trunk: spmm -> Linear -> ReLU (x2), then encoder -----
        g1 = jnp.maximum(dot(dot(x, adj), W('wg1')) + V('bg1'), 0.0)   # torch.spmm(x, adj)
        g2 = jnp.maximum(dot(dot(g1, adj), W('wg2')) + V('bg2'), 0.0)  # torch.spmm(g1, adj)
        z2 = bn_relu(dot(g2, W('we1')), 'gme1', 'bte1')
        z2 = bn_relu(dot(z2, W('we2')), 'gme2', 'bte2')

        # ----- c1 head without the lane-axis concat: split matmul + add -----
        zc = dot(z1, W('wc_mlp')) + dot(z2, W('wc_graph'))
        out_ref[...] = bn_relu(zc, 'gmc', 'btc').astype(out_ref.dtype)

    return kernel


# ---------------------------------------------------------------------------
# Wrapper: pack parameters into two operands, run one grid-less pallas_call
# ---------------------------------------------------------------------------
def graph_mlp_forward(x3, adj, params, mlp_channels, graph_channels):
    """x3: (3, N, Din) stacked A/P/N. Returns (3, N, out_dim) embeddings."""
    (w1, b1, gm1, bt1, w2, b2, gm2, bt2,
     wg1, bg1, wg2, bg2,
     we1, be1, gme1, bte1, we2, be2, gme2, bte2,
     wc, bc, gmc, btc) = params
    del b1, b2, be1, be2, bc  # cancelled exactly by the following BatchNorms

    three, n, din = x3.shape
    m1, m2 = mlp_channels
    g1d, g2d = graph_channels
    out_dim = m2

    # Split the c1 weight so the concat([z1, z2], axis=1) disappears.
    wc_mlp, wc_graph = wc[:m2], wc[m2:]

    # --- weight slab: rows concatenated, out-dim zero-padded to the max width ---
    weights = [('w1', w1), ('w2', w2), ('wg1', wg1), ('wg2', wg2),
               ('we1', we1), ('we2', we2), ('wc_mlp', wc_mlp), ('wc_graph', wc_graph)]
    wmax = max(int(w.shape[1]) for _, w in weights)
    wmeta, wrows, roff = {}, [], 0
    for name, w in weights:
        din_i, dout_i = int(w.shape[0]), int(w.shape[1])
        wmeta[name] = (roff, din_i, dout_i)
        wrows.append(jnp.pad(w, ((0, 0), (0, wmax - dout_i))))
        roff += din_i
    wslab = jnp.concatenate(wrows, axis=0)                     # (216, 32)

    # --- vector slab: all gammas/betas/ReLU-path biases lane-packed into (1, total) ---
    # 32-wide first, then 16-wide, then 8-wide -> no slice crosses a 128-lane tile.
    vectors = [('gm1', gm1), ('bt1', bt1), ('bg1', bg1), ('bg2', bg2),
               ('gme1', gme1), ('bte1', bte1),
               ('gm2', gm2), ('bt2', bt2), ('gmc', gmc), ('btc', btc),
               ('gme2', gme2), ('bte2', bte2)]
    vmeta, vcols, voff = {}, [], 0
    for name, v in vectors:
        d = int(v.shape[1])
        vmeta[name] = (voff, d)
        vcols.append(v)
        voff += d
    vslab = jnp.concatenate(vcols, axis=1)                     # (1, 272)

    x_flat = x3.reshape(three * n, din)                        # one 24-row batch

    kernel = _make_model_kernel(wmeta, vmeta, three, n)
    out = pl.pallas_call(
        kernel,
        out_shape=jax.ShapeDtypeStruct((three * n, out_dim), jnp.float32),
        # Single grid step: no grid / no dimension_semantics -> no 3-way imbalance
        # on v7x megacore and no per-step bookkeeping on v5e/v6e.
    )(x_flat, adj, wslab, vslab)
    return out.reshape(three, n, out_dim)


# ---------------------------------------------------------------------------
# Deterministic parameter init (shapes follow the PyTorch __init__)
# ---------------------------------------------------------------------------
def init_params(key, input_dim, graph_dim, mlp_channels, graph_channels):
    def lin(k, din, dout):
        k1, k2 = jax.random.split(k)
        w = jax.random.normal(k1, (din, dout), jnp.float32) / jnp.sqrt(float(din))
        b = 0.01 * jax.random.normal(k2, (1, dout), jnp.float32)
        return w, b

    def bn(k, d):
        k1, k2 = jax.random.split(k)
        g = 1.0 + 0.1 * jax.random.normal(k1, (1, d), jnp.float32)
        b = 0.1 * jax.random.normal(k2, (1, d), jnp.float32)
        return g, b

    ks = iter(jax.random.split(key, 20))
    m1, m2 = mlp_channels
    g1d, g2d = graph_channels

    w1, b1 = lin(next(ks), input_dim, m1); gm1, bt1 = bn(next(ks), m1)
    w2, b2 = lin(next(ks), m1, m2);        gm2, bt2 = bn(next(ks), m2)
    wg1, bg1 = lin(next(ks), input_dim, graph_dim)
    wg2, bg2 = lin(next(ks), graph_dim, graph_dim)
    we1, be1 = lin(next(ks), graph_dim, g1d); gme1, bte1 = bn(next(ks), g1d)
    we2, be2 = lin(next(ks), g1d, g2d);       gme2, bte2 = bn(next(ks), g2d)
    wc, bc = lin(next(ks), m2 + g2d, m2); gmc, btc = bn(next(ks), m2)

    return [w1, b1, gm1, bt1, w2, b2, gm2, bt2,
            wg1, bg1, wg2, bg2,
            we1, be1, gme1, bte1, we2, be2, gme2, bte2,
            wc, bc, gmc, btc]


# ---------------------------------------------------------------------------
# Pure-JAX reference (original formulation: biases kept, explicit concat)
# ---------------------------------------------------------------------------
def reference_forward(x, adj, params):
    (w1, b1, gm1, bt1, w2, b2, gm2, bt2,
     wg1, bg1, wg2, bg2,
     we1, be1, gme1, bte1, we2, be2, gme2, bte2,
     wc, bc, gmc, btc) = params

    def lin(h, w, b): return h @ w + b

    def bnrelu(h, g, bt):
        m = h.mean(0, keepdims=True)
        v = ((h - m) ** 2).mean(0, keepdims=True)
        return jnp.maximum((h - m) / jnp.sqrt(v + BN_EPS) * g + bt, 0.0)

    z1 = bnrelu(lin(x, w1, b1), gm1, bt1)
    z1 = bnrelu(lin(z1, w2, b2), gm2, bt2)
    g1 = jnp.maximum(lin(x @ adj, wg1, bg1), 0.0)
    g2 = jnp.maximum(lin(g1 @ adj, wg2, bg2), 0.0)
    z2 = bnrelu(lin(g2, we1, be1), gme1, bte1)
    z2 = bnrelu(lin(z2, we2, be2), gme2, bte2)
    comb = jnp.concatenate([z1, z2], axis=1)
    return bnrelu(lin(comb, wc, bc), gmc, btc)


def cosine_sim(a, b, eps=1e-6):
    na = jnp.maximum(jnp.linalg.norm(a, axis=1), eps)
    nb = jnp.maximum(jnp.linalg.norm(b, axis=1), eps)
    return jnp.sum(a * b, axis=1) / (na * nb)


# ---------------------------------------------------------------------------
if __name__ == "__main__":
    key = jax.random.PRNGKey(0)
    N, DIN = 8, 32                      # batch (cells), input features (genes)
    GRAPH_DIM = DIN                     # spmm(x, adj) requires graph_dim == input_dim
    MLP_CHANNELS = [32, 16]
    GRAPH_CHANNELS = [32, 8]
    OUT_DIM = MLP_CHANNELS[-1]

    ka, kp_, kn, kadj, kparams = jax.random.split(key, 5)
    A = jax.random.normal(ka, (N, DIN), jnp.float32)
    P = jax.random.normal(kp_, (N, DIN), jnp.float32)
    Nneg = jax.random.normal(kn, (N, DIN), jnp.float32)
    x3 = jnp.stack([A, P, Nneg], axis=0)                           # (3, N, DIN)
    # TODO(synk): torch.spmm uses a sparse adj; dense (DIN, DIN) matmul stand-in here.
    adj = jax.random.uniform(kadj, (DIN, DIN), jnp.float32) / DIN

    params = init_params(kparams, DIN, GRAPH_DIM, MLP_CHANNELS, GRAPH_CHANNELS)

    # Pallas kernel: forward() -> A_emb, P_emb, N_emb (single fused call)
    emb = graph_mlp_forward(x3, adj, params, MLP_CHANNELS, GRAPH_CHANNELS)
    emb = jax.block_until_ready(emb)

    # compute_loss(): triplet cosine loss (plain-JAX glue over the kernel output)
    A_emb, P_emb, N_emb = emb[0], emb[1], emb[2]
    loss = jnp.mean(jnp.maximum(cosine_sim(A_emb, N_emb) - cosine_sim(A_emb, P_emb) + 1.0, 0.0))
    loss = jax.block_until_ready(loss)

    # correctness vs pure-JAX reference (per-member, original formulation)
    ref = jnp.stack([reference_forward(x3[i], adj, params) for i in range(3)], axis=0)
    assert emb.shape == (3, N, OUT_DIM)
    assert jnp.allclose(emb, ref, atol=1e-4, rtol=1e-4), "kernel mismatch vs reference"
    assert jnp.isfinite(loss)

    print("KERNEL_OK")
</pallas_src>

<mosaic_0001>
module attributes {stable_mosaic.version = 11 : i64} {
  func.func @kernel(%arg0: memref<24x32xf32, #tpu.memory_space<vmem>>, %arg1: memref<32x32xf32, #tpu.memory_space<vmem>>, %arg2: memref<216x32xf32, #tpu.memory_space<vmem>>, %arg3: memref<1x272xf32, #tpu.memory_space<vmem>>, %arg4: memref<24x16xf32, #tpu.memory_space<vmem>>) attributes {dimension_semantics = [], scalar_prefetch = 0 : i64, scratch_operands = 0 : i64, tpu.core_type = #tpu.core_type<tc>} {
    %c0 = arith.constant 0 : index
    %c0_0 = arith.constant 0 : index
    %0 = vector.load %arg0[%c0, %c0_0] : memref<24x32xf32, #tpu.memory_space<vmem>>, vector<24x32xf32>
    %c0_1 = arith.constant 0 : index
    %c0_2 = arith.constant 0 : index
    %1 = vector.load %arg1[%c0_1, %c0_2] : memref<32x32xf32, #tpu.memory_space<vmem>>, vector<32x32xf32>
    %c0_3 = arith.constant 0 : index
    %c0_4 = arith.constant 0 : index
    %2 = vector.load %arg2[%c0_3, %c0_4] : memref<216x32xf32, #tpu.memory_space<vmem>>, vector<32x32xf32>
    %cst = arith.constant dense<0.000000e+00> : vector<24x32xf32>
    %3 = tpu.matmul %0, %2, %cst {dimension_numbers = #tpu.dot_dimension_numbers<[1], [0], [0], [1], [0, 0, 1, 1], [], []>} : vector<24x32xf32>, vector<32x32xf32>, vector<24x32xf32> -> vector<24x32xf32>
    %4 = vector.shape_cast %3 : vector<24x32xf32> to vector<3x8x32xf32>
    %cst_5 = arith.constant dense<0.000000e+00> : vector<3x32xf32>
    %5 = vector.multi_reduction <add>, %4, %cst_5 [1] : vector<3x8x32xf32> to vector<3x32xf32>
    %6 = vector.shape_cast %5 : vector<3x32xf32> to vector<3x1x32xf32>
    %cst_6 = arith.constant 8.000000e+00 : f32
    %7 = vector.broadcast %cst_6 : f32 to vector<3x1x32xf32>
    %8 = arith.divf %6, %7 : vector<3x1x32xf32>
    %9 = arith.mulf %4, %4 : vector<3x8x32xf32>
    %cst_7 = arith.constant dense<0.000000e+00> : vector<3x32xf32>
    %10 = vector.multi_reduction <add>, %9, %cst_7 [1] : vector<3x8x32xf32> to vector<3x32xf32>
    %11 = vector.shape_cast %10 : vector<3x32xf32> to vector<3x1x32xf32>
    %cst_8 = arith.constant 8.000000e+00 : f32
    %12 = vector.broadcast %cst_8 : f32 to vector<3x1x32xf32>
    %13 = arith.divf %11, %12 : vector<3x1x32xf32>
    %14 = arith.mulf %8, %8 : vector<3x1x32xf32>
    %15 = arith.subf %13, %14 : vector<3x1x32xf32>
    %cst_9 = arith.constant 0.000000e+00 : f32
    %16 = vector.broadcast %cst_9 : f32 to vector<3x1x32xf32>
    %17 = arith.maximumf %15, %16 : vector<3x1x32xf32>
    %c0_10 = arith.constant 0 : index
    %c0_11 = arith.constant 0 : index
    %18 = vector.load %arg3[%c0_10, %c0_11] : memref<1x272xf32, #tpu.memory_space<vmem>>, vector<1x32xf32>
    %cst_12 = arith.constant 9.99999974E-6 : f32
    %19 = vector.broadcast %cst_12 : f32 to vector<3x1x32xf32>
    %20 = arith.addf %17, %19 : vector<3x1x32xf32>
    %21 = math.rsqrt %20 : vector<3x1x32xf32>
    %22 = vector.shape_cast %18 : vector<1x32xf32> to vector<1x1x32xf32>
    %23 = vector.broadcast %22 : vector<1x1x32xf32> to vector<3x1x32xf32>
    %24 = arith.mulf %23, %21 : vector<3x1x32xf32>
    %25 = vector.broadcast %8 : vector<3x1x32xf32> to vector<3x8x32xf32>
    %26 = arith.subf %4, %25 : vector<3x8x32xf32>
    %27 = vector.broadcast %24 : vector<3x1x32xf32> to vector<3x8x32xf32>
    %28 = arith.mulf %26, %27 : vector<3x8x32xf32>
    %c0_13 = arith.constant 0 : index
    %c32 = arith.constant 32 : index
    %29 = vector.load %arg3[%c0_13, %c32] : memref<1x272xf32, #tpu.memory_space<vmem>>, vector<1x32xf32>
    %30 = vector.shape_cast %29 : vector<1x32xf32> to vector<1x1x32xf32>
    %31 = vector.broadcast %30 : vector<1x1x32xf32> to vector<3x8x32xf32>
    %32 = arith.addf %28, %31 : vector<3x8x32xf32>
    %cst_14 = arith.constant 0.000000e+00 : f32
    %33 = vector.broadcast %cst_14 : f32 to vector<3x8x32xf32>
    %34 = arith.maximumf %32, %33 : vector<3x8x32xf32>
    %35 = vector.shape_cast %34 : vector<3x8x32xf32> to vector<24x32xf32>
    %c32_15 = arith.constant 32 : index
    %c0_16 = arith.constant 0 : index
    %36 = vector.load %arg2[%c32_15, %c0_16] : memref<216x32xf32, #tpu.memory_space<vmem>>, vector<32x16xf32>
    %cst_17 = arith.constant dense<0.000000e+00> : vector<24x16xf32>
    %37 = tpu.matmul %35, %36, %cst_17 {dimension_numbers = #tpu.dot_dimension_numbers<[1], [0], [0], [1], [0, 0, 1, 1], [], []>} : vector<24x32xf32>, vector<32x16xf32>, vector<24x16xf32> -> vector<24x16xf32>
    %38 = vector.shape_cast %37 : vector<24x16xf32> to vector<3x8x16xf32>
    %cst_18 = arith.constant dense<0.000000e+00> : vector<3x16xf32>
    %39 = vector.multi_reduction <add>, %38, %cst_18 [1] : vector<3x8x16xf32> to vector<3x16xf32>
    %40 = vector.shape_cast %39 : vector<3x16xf32> to vector<3x1x16xf32>
    %cst_19 = arith.constant 8.000000e+00 : f32
    %41 = vector.broadcast %cst_19 : f32 to vector<3x1x16xf32>
    %42 = arith.divf %40, %41 : vector<3x1x16xf32>
    %43 = arith.mulf %38, %38 : vector<3x8x16xf32>
    %cst_20 = arith.constant dense<0.000000e+00> : vector<3x16xf32>
    %44 = vector.multi_reduction <add>, %43, %cst_20 [1] : vector<3x8x16xf32> to vector<3x16xf32>
    %45 = vector.shape_cast %44 : vector<3x16xf32> to vector<3x1x16xf32>
    %cst_21 = arith.constant 8.000000e+00 : f32
    %46 = vector.broadcast %cst_21 : f32 to vector<3x1x16xf32>
    %47 = arith.divf %45, %46 : vector<3x1x16xf32>
    %48 = arith.mulf %42, %42 : vector<3x1x16xf32>
    %49 = arith.subf %47, %48 : vector<3x1x16xf32>
    %cst_22 = arith.constant 0.000000e+00 : f32
    %50 = vector.broadcast %cst_22 : f32 to vector<3x1x16xf32>
    %51 = arith.maximumf %49, %50 : vector<3x1x16xf32>
    %c0_23 = arith.constant 0 : index
    %c192 = arith.constant 192 : index
    %52 = vector.load %arg3[%c0_23, %c192] : memref<1x272xf32, #tpu.memory_space<vmem>>, vector<1x16xf32>
    %cst_24 = arith.constant 9.99999974E-6 : f32
    %53 = vector.broadcast %cst_24 : f32 to vector<3x1x16xf32>
    %54 = arith.addf %51, %53 : vector<3x1x16xf32>
    %55 = math.rsqrt %54 : vector<3x1x16xf32>
    %56 = vector.shape_cast %52 : vector<1x16xf32> to vector<1x1x16xf32>
    %57 = vector.broadcast %56 : vector<1x1x16xf32> to vector<3x1x16xf32>
    %58 = arith.mulf %57, %55 : vector<3x1x16xf32>
    %59 = vector.broadcast %42 : vector<3x1x16xf32> to vector<3x8x16xf32>
    %60 = arith.subf %38, %59 : vector<3x8x16xf32>
    %61 = vector.broadcast %58 : vector<3x1x16xf32> to vector<3x8x16xf32>
    %62 = arith.mulf %60, %61 : vector<3x8x16xf32>
    %c0_25 = arith.constant 0 : index
    %c208 = arith.constant 208 : index
    %63 = vector.load %arg3[%c0_25, %c208] : memref<1x272xf32, #tpu.memory_space<vmem>>, vector<1x16xf32>
    %64 = vector.shape_cast %63 : vector<1x16xf32> to vector<1x1x16xf32>
    %65 = vector.broadcast %64 : vector<1x1x16xf32> to vector<3x8x16xf32>
    %66 = arith.addf %62, %65 : vector<3x8x16xf32>
    %cst_26 = arith.constant 0.000000e+00 : f32
    %67 = vector.broadcast %cst_26 : f32 to vector<3x8x16xf32>
    %68 = arith.maximumf %66, %67 : vector<3x8x16xf32>
    %69 = vector.shape_cast %68 : vector<3x8x16xf32> to vector<24x16xf32>
    %cst_27 = arith.constant dense<0.000000e+00> : vector<24x32xf32>
    %70 = tpu.matmul %0, %1, %cst_27 {dimension_numbers = #tpu.dot_dimension_numbers<[1], [0], [0], [1], [0, 0, 1, 1], [], []>} : vector<24x32xf32>, vector<32x32xf32>, vector<24x32xf32> -> vector<24x32xf32>
    %c64 = arith.constant 64 : index
    %c0_28 = arith.constant 0 : index
    %71 = vector.load %arg2[%c64, %c0_28] : memref<216x32xf32, #tpu.memory_space<vmem>>, vector<32x32xf32>
    %cst_29 = arith.constant dense<0.000000e+00> : vector<24x32xf32>
    %72 = tpu.matmul %70, %71, %cst_29 {dimension_numbers = #tpu.dot_dimension_numbers<[1], [0], [0], [1], [0, 0, 1, 1], [], []>} : vector<24x32xf32>, vector<32x32xf32>, vector<24x32xf32> -> vector<24x32xf32>
    %c0_30 = arith.constant 0 : index
    %c64_31 = arith.constant 64 : index
    %73 = vector.load %arg3[%c0_30, %c64_31] : memref<1x272xf32, #tpu.memory_space<vmem>>, vector<1x32xf32>
    %74 = vector.broadcast %73 : vector<1x32xf32> to vector<24x32xf32>
    %75 = arith.addf %72, %74 : vector<24x32xf32>
    %cst_32 = arith.constant 0.000000e+00 : f32
    %76 = vector.broadcast %cst_32 : f32 to vector<24x32xf32>
    %77 = arith.maximumf %75, %76 : vector<24x32xf32>
    %cst_33 = arith.constant dense<0.000000e+00> : vector<24x32xf32>
    %78 = tpu.matmul %77, %1, %cst_33 {dimension_numbers = #tpu.dot_dimension_numbers<[1], [0], [0], [1], [0, 0, 1, 1], [], []>} : vector<24x32xf32>, vector<32x32xf32>, vector<24x32xf32> -> vector<24x32xf32>
    %c96 = arith.constant 96 : index
    %c0_34 = arith.constant 0 : index
    %79 = vector.load %arg2[%c96, %c0_34] : memref<216x32xf32, #tpu.memory_space<vmem>>, vector<32x32xf32>
    %cst_35 = arith.constant dense<0.000000e+00> : vector<24x32xf32>
    %80 = tpu.matmul %78, %79, %cst_35 {dimension_numbers = #tpu.dot_dimension_numbers<[1], [0], [0], [1], [0, 0, 1, 1], [], []>} : vector<24x32xf32>, vector<32x32xf32>, vector<24x32xf32> -> vector<24x32xf32>
    %c0_36 = arith.constant 0 : index
    %c96_37 = arith.constant 96 : index
    %81 = vector.load %arg3[%c0_36, %c96_37] : memref<1x272xf32, #tpu.memory_space<vmem>>, vector<1x32xf32>
    %82 = vector.broadcast %81 : vector<1x32xf32> to vector<24x32xf32>
    %83 = arith.addf %80, %82 : vector<24x32xf32>
    %cst_38 = arith.constant 0.000000e+00 : f32
    %84 = vector.broadcast %cst_38 : f32 to vector<24x32xf32>
    %85 = arith.maximumf %83, %84 : vector<24x32xf32>
    %c128 = arith.constant 128 : index
    %c0_39 = arith.constant 0 : index
    %86 = vector.load %arg2[%c128, %c0_39] : memref<216x32xf32, #tpu.memory_space<vmem>>, vector<32x32xf32>
    %cst_40 = arith.constant dense<0.000000e+00> : vector<24x32xf32>
    %87 = tpu.matmul %85, %86, %cst_40 {dimension_numbers = #tpu.dot_dimension_numbers<[1], [0], [0], [1], [0, 0, 1, 1], [], []>} : vector<24x32xf32>, vector<32x32xf32>, vector<24x32xf32> -> vector<24x32xf32>
    %88 = vector.shape_cast %87 : vector<24x32xf32> to vector<3x8x32xf32>
    %cst_41 = arith.constant dense<0.000000e+00> : vector<3x32xf32>
    %89 = vector.multi_reduction <add>, %88, %cst_41 [1] : vector<3x8x32xf32> to vector<3x32xf32>
    %90 = vector.shape_cast %89 : vector<3x32xf32> to vector<3x1x32xf32>
    %cst_42 = arith.constant 8.000000e+00 : f32
    %91 = vector.broadcast %cst_42 : f32 to vector<3x1x32xf32>
    %92 = arith.divf %90, %91 : vector<3x1x32xf32>
    %93 = arith.mulf %88, %88 : vector<3x8x32xf32>
    %cst_43 = arith.constant dense<0.000000e+00> : vector<3x32xf32>
    %94 = vector.multi_reduction <add>, %93, %cst_43 [1] : vector<3x8x32xf32> to vector<3x32xf32>
    %95 = vector.shape_cast %94 : vector<3x32xf32> to vector<3x1x32xf32>
    %cst_44 = arith.constant 8.000000e+00 : f32
    %96 = vector.broadcast %cst_44 : f32 to vector<3x1x32xf32>
    %97 = arith.divf %95, %96 : vector<3x1x32xf32>
    %98 = arith.mulf %92, %92 : vector<3x1x32xf32>
    %99 = arith.subf %97, %98 : vector<3x1x32xf32>
    %cst_45 = arith.constant 0.000000e+00 : f32
    %100 = vector.broadcast %cst_45 : f32 to vector<3x1x32xf32>
    %101 = arith.maximumf %99, %100 : vector<3x1x32xf32>
    %c0_46 = arith.constant 0 : index
    %c128_47 = arith.constant 128 : index
    %102 = vector.load %arg3[%c0_46, %c128_47] : memref<1x272xf32, #tpu.memory_space<vmem>>, vector<1x32xf32>
    %cst_48 = arith.constant 9.99999974E-6 : f32
    %103 = vector.broadcast %cst_48 : f32 to vector<3x1x32xf32>
    %104 = arith.addf %101, %103 : vector<3x1x32xf32>
    %105 = math.rsqrt %104 : vector<3x1x32xf32>
    %106 = vector.shape_cast %102 : vector<1x32xf32> to vector<1x1x32xf32>
    %107 = vector.broadcast %106 : vector<1x1x32xf32> to vector<3x1x32xf32>
    %108 = arith.mulf %107, %105 : vector<3x1x32xf32>
    %109 = vector.broadcast %92 : vector<3x1x32xf32> to vector<3x8x32xf32>
    %110 = arith.subf %88, %109 : vector<3x8x32xf32>
    %111 = vector.broadcast %108 : vector<3x1x32xf32> to vector<3x8x32xf32>
    %112 = arith.mulf %110, %111 : vector<3x8x32xf32>
    %c0_49 = arith.constant 0 : index
    %c160 = arith.constant 160 : index
    %113 = vector.load %arg3[%c0_49, %c160] : memref<1x272xf32, #tpu.memory_space<vmem>>, vector<1x32xf32>
    %114 = vector.shape_cast %113 : vector<1x32xf32> to vector<1x1x32xf32>
    %115 = vector.broadcast %114 : vector<1x1x32xf32> to vector<3x8x32xf32>
    %116 = arith.addf %112, %115 : vector<3x8x32xf32>
    %cst_50 = arith.constant 0.000000e+00 : f32
    %117 = vector.broadcast %cst_50 : f32 to vector<3x8x32xf32>
    %118 = arith.maximumf %116, %117 : vector<3x8x32xf32>
    %119 = vector.shape_cast %118 : vector<3x8x32xf32> to vector<24x32xf32>
    %c160_51 = arith.constant 160 : index
    %c0_52 = arith.constant 0 : index
    %120 = vector.load %arg2[%c160_51, %c0_52] : memref<216x32xf32, #tpu.memory_space<vmem>>, vector<32x8xf32>
    %cst_53 = arith.constant dense<0.000000e+00> : vector<24x8xf32>
    %121 = tpu.matmul %119, %120, %cst_53 {dimension_numbers = #tpu.dot_dimension_numbers<[1], [0], [0], [1], [0, 0, 1, 1], [], []>} : vector<24x32xf32>, vector<32x8xf32>, vector<24x8xf32> -> vector<24x8xf32>
    %122 = vector.shape_cast %121 : vector<24x8xf32> to vector<3x8x8xf32>
    %cst_54 = arith.constant dense<0.000000e+00> : vector<3x8xf32>
    %123 = vector.multi_reduction <add>, %122, %cst_54 [1] : vector<3x8x8xf32> to vector<3x8xf32>
    %124 = vector.shape_cast %123 : vector<3x8xf32> to vector<3x1x8xf32>
    %cst_55 = arith.constant 8.000000e+00 : f32
    %125 = vector.broadcast %cst_55 : f32 to vector<3x1x8xf32>
    %126 = arith.divf %124, %125 : vector<3x1x8xf32>
    %127 = arith.mulf %122, %122 : vector<3x8x8xf32>
    %cst_56 = arith.constant dense<0.000000e+00> : vector<3x8xf32>
    %128 = vector.multi_reduction <add>, %127, %cst_56 [1] : vector<3x8x8xf32> to vector<3x8xf32>
    %129 = vector.shape_cast %128 : vector<3x8xf32> to vector<3x1x8xf32>
    %cst_57 = arith.constant 8.000000e+00 : f32
    %130 = vector.broadcast %cst_57 : f32 to vector<3x1x8xf32>
    %131 = arith.divf %129, %130 : vector<3x1x8xf32>
    %132 = arith.mulf %126, %126 : vector<3x1x8xf32>
    %133 = arith.subf %131, %132 : vector<3x1x8xf32>
    %cst_58 = arith.constant 0.000000e+00 : f32
    %134 = vector.broadcast %cst_58 : f32 to vector<3x1x8xf32>
    %135 = arith.maximumf %133, %134 : vector<3x1x8xf32>
    %c0_59 = arith.constant 0 : index
    %c256 = arith.constant 256 : index
    %136 = vector.load %arg3[%c0_59, %c256] : memref<1x272xf32, #tpu.memory_space<vmem>>, vector<1x8xf32>
    %cst_60 = arith.constant 9.99999974E-6 : f32
    %137 = vector.broadcast %cst_60 : f32 to vector<3x1x8xf32>
    %138 = arith.addf %135, %137 : vector<3x1x8xf32>
    %139 = math.rsqrt %138 : vector<3x1x8xf32>
    %140 = vector.shape_cast %136 : vector<1x8xf32> to vector<1x1x8xf32>
    %141 = vector.broadcast %140 : vector<1x1x8xf32> to vector<3x1x8xf32>
    %142 = arith.mulf %141, %139 : vector<3x1x8xf32>
    %143 = vector.broadcast %126 : vector<3x1x8xf32> to vector<3x8x8xf32>
    %144 = arith.subf %122, %143 : vector<3x8x8xf32>
    %145 = vector.broadcast %142 : vector<3x1x8xf32> to vector<3x8x8xf32>
    %146 = arith.mulf %144, %145 : vector<3x8x8xf32>
    %c0_61 = arith.constant 0 : index
    %c264 = arith.constant 264 : index
    %147 = vector.load %arg3[%c0_61, %c264] : memref<1x272xf32, #tpu.memory_space<vmem>>, vector<1x8xf32>
    %148 = vector.shape_cast %147 : vector<1x8xf32> to vector<1x1x8xf32>
    %149 = vector.broadcast %148 : vector<1x1x8xf32> to vector<3x8x8xf32>
    %150 = arith.addf %146, %149 : vector<3x8x8xf32>
    %cst_62 = arith.constant 0.000000e+00 : f32
    %151 = vector.broadcast %cst_62 : f32 to vector<3x8x8xf32>
    %152 = arith.maximumf %150, %151 : vector<3x8x8xf32>
    %153 = vector.shape_cast %152 : vector<3x8x8xf32> to vector<24x8xf32>
    %c192_63 = arith.constant 192 : index
    %c0_64 = arith.constant 0 : index
    %154 = vector.load %arg2[%c192_63, %c0_64] : memref<216x32xf32, #tpu.memory_space<vmem>>, vector<16x16xf32>
    %cst_65 = arith.constant dense<0.000000e+00> : vector<24x16xf32>
    %155 = tpu.matmul %69, %154, %cst_65 {dimension_numbers = #tpu.dot_dimension_numbers<[1], [0], [0], [1], [0, 0, 1, 1], [], []>} : vector<24x16xf32>, vector<16x16xf32>, vector<24x16xf32> -> vector<24x16xf32>
    %c208_66 = arith.constant 208 : index
    %c0_67 = arith.constant 0 : index
    %156 = vector.load %arg2[%c208_66, %c0_67] : memref<216x32xf32, #tpu.memory_space<vmem>>, vector<8x16xf32>
    %cst_68 = arith.constant dense<0.000000e+00> : vector<24x16xf32>
    %157 = tpu.matmul %153, %156, %cst_68 {dimension_numbers = #tpu.dot_dimension_numbers<[1], [0], [0], [1], [0, 0, 1, 1], [], []>} : vector<24x8xf32>, vector<8x16xf32>, vector<24x16xf32> -> vector<24x16xf32>
    %158 = arith.addf %155, %157 : vector<24x16xf32>
    %159 = vector.shape_cast %158 : vector<24x16xf32> to vector<3x8x16xf32>
    %cst_69 = arith.constant dense<0.000000e+00> : vector<3x16xf32>
    %160 = vector.multi_reduction <add>, %159, %cst_69 [1] : vector<3x8x16xf32> to vector<3x16xf32>
    %161 = vector.shape_cast %160 : vector<3x16xf32> to vector<3x1x16xf32>
    %cst_70 = arith.constant 8.000000e+00 : f32
    %162 = vector.broadcast %cst_70 : f32 to vector<3x1x16xf32>
    %163 = arith.divf %161, %162 : vector<3x1x16xf32>
    %164 = arith.mulf %159, %159 : vector<3x8x16xf32>
    %cst_71 = arith.constant dense<0.000000e+00> : vector<3x16xf32>
    %165 = vector.multi_reduction <add>, %164, %cst_71 [1] : vector<3x8x16xf32> to vector<3x16xf32>
    %166 = vector.shape_cast %165 : vector<3x16xf32> to vector<3x1x16xf32>
    %cst_72 = arith.constant 8.000000e+00 : f32
    %167 = vector.broadcast %cst_72 : f32 to vector<3x1x16xf32>
    %168 = arith.divf %166, %167 : vector<3x1x16xf32>
    %169 = arith.mulf %163, %163 : vector<3x1x16xf32>
    %170 = arith.subf %168, %169 : vector<3x1x16xf32>
    %cst_73 = arith.constant 0.000000e+00 : f32
    %171 = vector.broadcast %cst_73 : f32 to vector<3x1x16xf32>
    %172 = arith.maximumf %170, %171 : vector<3x1x16xf32>
    %c0_74 = arith.constant 0 : index
    %c224 = arith.constant 224 : index
    %173 = vector.load %arg3[%c0_74, %c224] : memref<1x272xf32, #tpu.memory_space<vmem>>, vector<1x16xf32>
    %cst_75 = arith.constant 9.99999974E-6 : f32
    %174 = vector.broadcast %cst_75 : f32 to vector<3x1x16xf32>
    %175 = arith.addf %172, %174 : vector<3x1x16xf32>
    %176 = math.rsqrt %175 : vector<3x1x16xf32>
    %177 = vector.shape_cast %173 : vector<1x16xf32> to vector<1x1x16xf32>
    %178 = vector.broadcast %177 : vector<1x1x16xf32> to vector<3x1x16xf32>
    %179 = arith.mulf %178, %176 : vector<3x1x16xf32>
    %180 = vector.broadcast %163 : vector<3x1x16xf32> to vector<3x8x16xf32>
    %181 = arith.subf %159, %180 : vector<3x8x16xf32>
    %182 = vector.broadcast %179 : vector<3x1x16xf32> to vector<3x8x16xf32>
    %183 = arith.mulf %181, %182 : vector<3x8x16xf32>
    %c0_76 = arith.constant 0 : index
    %c240 = arith.constant 240 : index
    %184 = vector.load %arg3[%c0_76, %c240] : memref<1x272xf32, #tpu.memory_space<vmem>>, vector<1x16xf32>
    %185 = vector.shape_cast %184 : vector<1x16xf32> to vector<1x1x16xf32>
    %186 = vector.broadcast %185 : vector<1x1x16xf32> to vector<3x8x16xf32>
    %187 = arith.addf %183, %186 : vector<3x8x16xf32>
    %cst_77 = arith.constant 0.000000e+00 : f32
    %188 = vector.broadcast %cst_77 : f32 to vector<3x8x16xf32>
    %189 = arith.maximumf %187, %188 : vector<3x8x16xf32>
    %190 = vector.shape_cast %189 : vector<3x8x16xf32> to vector<24x16xf32>
    %c0_78 = arith.constant 0 : index
    %c0_79 = arith.constant 0 : index
    %191 = vector.load %arg4[%c0_78, %c0_79] : memref<24x16xf32, #tpu.memory_space<vmem>>, vector<24x16xf32>
    tpu.vector_store %arg4[%c0_78, %c0_79], %190 {strides = array<i32>} : memref<24x16xf32, #tpu.memory_space<vmem>>, vector<24x16xf32>,
    return
  }
}

</mosaic_0001>

<bundles_post_ra>
// kernel: tpu_custom_call.1
= control target key start
LH: loop header
LB: loop body
LE: loop exit
PB: predicated region body
PF: predicated region fallthrough
CT: control target
= control target key end

     0   :  { %v1970_v0 = vmov 0.0|0.0   ;;  %vm1971_vm0 = vmmov 0   ;;  %v1972_v4 = vmov 0.0   ;;  %v195_v5 = vlaneseq  ;;  %s1973_s8 = smov 96   ;;  %s1974_s22 = smov 64   ;;  %s2493_s2 = inlined_call_operand.vmem [shape: f32[216,32], index: 2, kind: input, shape index: {}]   ;;  %s2494_s1 = inlined_call_operand.vmem [shape: f32[32,32], index: 1, kind: input, shape index: {}]   ;;  %s2495_s3 = inlined_call_operand.vmem [shape: f32[1,272], index: 3, kind: input, shape index: {}]   ;;  %s2496_s0 = inlined_call_operand.vmem [shape: f32[24,32], index: 0, kind: input, shape index: {}]   ;;  %s2497_s4 = inlined_call_operand.vmem [shape: f32[24,16], index: 4, kind: output, shape index: {}]  }
   0x1   :  { %1872 = vmatprep.subr.bf16.mxu1 %v1970_v0  ;;  %v24_v1 = vld [vmem:[%s2493_s2] sm:$0xff]  ;;  %v25_v2 = vld [vmem:[%s2493_s2 + $0x8] sm:$0xff]  ;;  %v26_v3 = vld [vmem:[%s2493_s2 + $0x10] sm:$0xff]  ;;  %1720 = vmatprep.mubr.msk.f32.mxu1 %vm1971_vm0, %v1972_v4  ;;  %vm28_vm1 = vcmask 261120   ;;  %s1975_s7 = smov 32   ;;  %vm320_vm2 = vcmask 130048  }
   0x2   :  { %v1873_v6 = vpack.c.bf16 %v25_v2, %v24_v1  ;;  %v27_v7 = vld [vmem:[%s2493_s2 + $0x18] sm:$0xff]  ;;  %1884 = vmatprep.subr.bf16.mxu0 %v1970_v0  ;;  %1754 = vmatprep.mubr.msk.f32.mxu0 %vm1971_vm0, %v1972_v4  ;;  %v20_v8 = vld [vmem:[%s2494_s1] sm:$0xff]  ;;  %v21_v9 = vld [vmem:[%s2494_s1 + $0x8] sm:$0xff]  ;;  %v2029_v10 = vshrl.u32 %v195_v5, 7  ;;  %s1977_s17 = smov 120   ;;  %s1978_s18 = smov 48  }
   0x3   :  { %v1876_v11 = vpack.c.bf16 %v27_v7, %v26_v3  ;;  %v1885_v12 = vpack.c.bf16 %v21_v9, %v20_v8  ;;  %v22_v13 = vld [vmem:[%s2494_s1 + $0x10] sm:$0xff]  ;;  %v23_v14 = vld [vmem:[%s2494_s1 + $0x18] sm:$0xff]  ;;  %v2040_v15 = vld [vmem:[%s2495_s3] sm:$0x1]  ;;  %vm1150_vm3 = vcmask 64512  }
   0x4   :  { %1874 = vmatpush3.bf16.msra.mxu1 %v1873_v6  ;;  %v2044_v16 = vsub.s32 0, %v2029_v10  ;;  %v1888_v17 = vpack.c.bf16 %v23_v14, %v22_v13  ;;  %v17_v19 = vld [vmem:[%s2496_s0] sm:$0xff]  ;;  %v18_v20 = vld [vmem:[%s2496_s0 + $0x8] sm:$0xff]  ;;  %v19_v21 = vld [vmem:[%s2496_s0 + $0x10] sm:$0xff] }
   0x5   :  { %1875 = vmatprep.subr.bf16.mxu1 %v1970_v0  ;;  %1886 = vmatpush3.bf16.msra.mxu0 %v1885_v12  ;;  %v227_v22 = vld [vmem:[%s2493_s2 + $0x20] sm:$0xff]  ;;  %v228_v23 = vld [vmem:[%s2493_s2 + $0x28] sm:$0xff]  ;;  %v229_v24 = vld [vmem:[%s2493_s2 + $0x30] sm:$0xff] }
   0x6   :  { %1887 = vmatprep.subr.bf16.mxu0 %v1970_v0  ;;  %v217_v18 = vrot.slane %v2040_v15, %v2044_v16  ;;  %v1879_v25 = vpack.c.bf16 %v228_v23, %v227_v22  ;;  %v230_v26 = vld [vmem:[%s2493_s2 + $0x38] sm:$0xff]  ;;  %v2098_v28 = vld [vmem:[%s2495_s3] ss:$0 sm:$0xff] }
   0x7   :  { %v1882_v27 = vpack.c.bf16 %v230_v26, %v229_v24  ;;  %767 = vrot.lane.b32.xlu1 %v2098_v28, %s1975_s7 }
   0x8   :  { %1877 = vmatpush3.bf16.msra.mxu1 %v1876_v11  ;;  %218 = vrot.lane.b32.xlu0 %v217_v18, %s1973_s8 }
   0x9   :  { %1878 = vmatprep.subr.bf16.mxu1 %v1970_v0  ;;  %1889 = vmatpush3.bf16.msra.mxu0 %v1888_v17 }
   0xa   :  { %1896 = vmatprep.subr.bf16.mxu0 %v1970_v0 }
   0xb   :  { %1721 = vmatmul.mubr.msk.f32.vlgmr.msra.gmra.mrb[0].mxu1 %vm28_vm1, %v17_v19 }
   0xc   :  { %1723 = vmatprep.mubr.msk.f32.mxu1 %vm1971_vm0, %v1972_v4  ;;  %1755 = vmatmul.mubr.msk.f32.vlgmr.msra.gmra.mrb[0].mxu0 %vm28_vm1, %v17_v19 }
   0xd   :  { %1757 = vmatprep.mubr.msk.f32.mxu0 %vm1971_vm0, %v1972_v4  ;;  %1898 = vmatpush3.bf16.msra.mxu0 %v1885_v12 }
   0xe   :  { %1899 = vmatprep.subr.bf16.mxu0 %v1970_v0  ;;  %1880 = vmatpush3.bf16.msra.mxu1 %v1879_v25 }
   0xf   :  { %1724 = vmatmul.mubr.msk.f32.gmra.mrb[2].mxu1 %vm28_vm1, %v18_v20  ;;  %1881 = vmatprep.subr.bf16.mxu1 %v1970_v0 }
  0x10   :  { %1726 = vmatprep.mubr.msk.f32.mxu1 %vm1971_vm0, %v1972_v4  ;;  %1758 = vmatmul.mubr.msk.f32.gmra.mrb[2].mxu0 %vm28_vm1, %v18_v20 }
  0x11   :  { %1760 = vmatprep.mubr.msk.f32.mxu0 %vm1971_vm0, %v1972_v4  ;;  %1901 = vmatpush3.bf16.msra.mxu0 %v1888_v17 }
  0x12   :  { %1908 = vmatprep.subr.bf16.mxu0 %v1970_v0  ;;  %1883 = vmatpush3.bf16.msra.mxu1 %v1882_v27 }
  0x13   :  { %1727 = vmatmul.mubr.msk.f32.gmra.mrb[4].mxu1 %vm28_vm1, %v19_v21  ;;  %1890 = vmatprep.subr.bf16.mxu1 %v1970_v0 }
  0x14   :  { %1737 = vmatprep.mubr.msk.f32.mxu1 %vm1971_vm0, %v1972_v4  ;;  %1761 = vmatmul.mubr.msk.f32.gmra.mrb[4].mxu0 %vm28_vm1, %v19_v21 }
  0x15   :  { %1788 = vmatprep.mubr.msk.f32.mxu0 %vm1971_vm0, %v1972_v4  ;;  %579 = vrot.lane.b32.xlu0 %v2098_v28, %s1974_s22 }
  0xde   :  { %v2102_v29 = vpop.f32.mrb[0].mxu1 }
  0xdf   :  { %v118_v30 = vsel %vm28_vm1, %v2102_v29, 0.0  ;;  %v143_v31 = vmul.f32 %v2102_v29, %v2102_v29  ;;  %v1722_v32 = vpop.f32.mrb[1].mxu1  ;;  %v2108_v34 = vpop.f32.mrb[0].mxu0 }
  0xe0   :  { %v119_v33 = vrot.slane %v118_v30, 4  ;;  %v1756_v36 = vpop.f32.mrb[1].mxu0 }
  0xe1   :  { %v146_v35 = vsel %vm28_vm1, %v143_v31, 0.0 }
  0xe2   :  { %v120_v37 = vadd.f32 %v119_v33, %v118_v30  ;;  %v147_v38 = vrot.slane %v146_v35, 4  ;;  %v2111_v39 = vpop.f32.mrb[2].mxu1 }
  0xe3   :  { %v125_v40 = vsel %vm28_vm1, %v2111_v39, 0.0  ;;  %v144_v41 = vmul.f32 %v2111_v39, %v2111_v39  ;;  %v1725_v42 = vpop.f32.mrb[3].mxu1  ;;  %v2117_v46 = vpop.f32.mrb[2].mxu0 }
  0xe4   :  { %v121_v43 = vrot.slane %v120_v37, 2  ;;  %v148_v44 = vadd.f32 %v147_v38, %v146_v35  ;;  %v126_v45 = vrot.slane %v125_v40, 4  ;;  %v1759_v48 = vpop.f32.mrb[3].mxu0 }
  0xe5   :  { %v153_v47 = vsel %vm28_vm1, %v144_v41, 0.0 }
  0xe6   :  { %v122_v49 = vadd.f32 %v121_v43, %v120_v37  ;;  %v149_v50 = vrot.slane %v148_v44, 2  ;;  %v127_v51 = vadd.f32 %v126_v45, %v125_v40  ;;  %v154_v52 = vrot.slane %v153_v47, 4  ;;  %v2120_v53 = vpop.f32.mrb[4].mxu1 }
  0xe7   :  { %v132_v54 = vsel %vm28_vm1, %v2120_v53, 0.0  ;;  %v145_v55 = vmul.f32 %v2120_v53, %v2120_v53  ;;  %v1728_v56 = vpop.f32.mrb[5].mxu1  ;;  %v2126_v61 = vpop.f32.mrb[4].mxu0 }
  0xe8   :  { %v123_v57 = vrot.slane %v122_v49, 1  ;;  %v150_v58 = vadd.f32 %v149_v50, %v148_v44  ;;  %v128_v59 = vrot.slane %v127_v51, 2  ;;  %v155_v60 = vadd.f32 %v154_v52, %v153_v47  ;;  %v1762_v1 = vpop.f32.mrb[5].mxu0 }
  0xe9   :  { %v133_v62 = vrot.slane %v132_v54, 4  ;;  %v160_v63 = vsel %vm28_vm1, %v145_v55, 0.0  ;;  %v219_v55 = vpop.permute.xlu0 %218 }
  0xea   :  { %v124_v2 = vadd.f32 %v123_v57, %v122_v49  ;;  %v151_v3 = vrot.slane %v150_v58, 1  ;;  %v129_v5 = vadd.f32 %v128_v59, %v127_v51  ;;  %v156_v6 = vrot.slane %v155_v60, 2  ;;  %v570_v59 = vld [vmem:[%s2493_s2 + $0x48] sm:$0xff] }
  0xeb   :  { %v134_v7 = vadd.f32 %v133_v62, %v132_v54  ;;  %v161_v8 = vrot.slane %v160_v63, 4 }
  0xec   :  { %v140_v9 = vmul.f32 0.125, %v124_v2  ;;  %v152_v11 = vadd.f32 %v151_v3, %v150_v58  ;;  %v130_v12 = vrot.slane %v129_v5, 1  ;;  %v157_v13 = vadd.f32 %v156_v6, %v155_v60  ;;  %v569_v58 = vld [vmem:[%s2493_s2 + $0x40] sm:$0xff] }
  0xed   :  { %v135_v14 = vrot.slane %v134_v7, 2  ;;  %v162_v17 = vadd.f32 %v161_v8, %v160_v63  ;;  %v1891_v1 = vpack.c.bf16 %v570_v59, %v569_v58  ;;  %v572_v8 = vld [vmem:[%s2493_s2 + $0x58] sm:$0xff] }
  0xee   :  { %v167_v18 = vmul.f32 0.125, %v152_v11  ;;  %v170_v19 = vmul.f32 %v140_v9, %v140_v9  ;;  %v131_v20 = vadd.f32 %v130_v12, %v129_v5  ;;  %v158_v21 = vrot.slane %v157_v13, 1 }
  0xef   :  { %v136_v22 = vadd.f32 %v135_v14, %v134_v7  ;;  %v163_v23 = vrot.slane %v162_v17, 2  ;;  %v189_v52 = vsub.f32 %v2102_v29, %v140_v9  ;;  %v571_v7 = vld [vmem:[%s2493_s2 + $0x50] sm:$0xff] }
  0xf0   :  { %v173_v24 = vsub.f32 %v167_v18, %v170_v19  ;;  %v141_v25 = vmul.f32 0.125, %v131_v20  ;;  %v159_v26 = vadd.f32 %v158_v21, %v157_v13 }
  0xf1   :  { %v137_v27 = vrot.slane %v136_v22, 1  ;;  %v164_v30 = vadd.f32 %v163_v23, %v162_v17  ;;  %v2176_v17 = vld [vmem:[%s2495_s3 + $0x1] sm:$0x1] }
  0xf2   :  { %v176_v31 = vmax.f32 %v173_v24, 0.0  ;;  %v171_v32 = vmul.f32 %v141_v25, %v141_v25  ;;  %v168_v33 = vmul.f32 0.125, %v159_v26  ;;  %v190_v63 = vsub.f32 %v2111_v39, %v141_v25 }
  0xf3   :  { %v138_v35 = vadd.f32 %v137_v27, %v136_v22  ;;  %v165_v36 = vrot.slane %v164_v30, 1 }
  0xf4   :  { %v180_v37 = vadd.f32 1e-05, %v176_v31  ;;  %v174_v38 = vsub.f32 %v168_v33, %v171_v32 }
  0xf5   :  { %v142_v40 = vmul.f32 0.125, %v138_v35  ;;  %v166_v41 = vadd.f32 %v165_v36, %v164_v30 }
  0xf6   :  { %1939 = vrsqrt.f32 %v180_v37  ;;  %v177_v42 = vmax.f32 %v174_v38, 0.0 }
  0xf7   :  { %v169_v43 = vmul.f32 0.125, %v166_v41  ;;  %v172_v44 = vmul.f32 %v142_v40, %v142_v40  ;;  %v191_v39 = vsub.f32 %v2120_v53, %v142_v40 }
  0xf8   :  { %v181_v45 = vadd.f32 1e-05, %v177_v42 }
  0xf9   :  { %v175_v47 = vsub.f32 %v169_v43, %v172_v44 }
  0xfa   :  { %1941 = vrsqrt.f32 %v181_v45 }
  0xfb   :  { %v178_v48 = vmax.f32 %v175_v47, 0.0 }
  0xfd   :  { %v182_v49 = vadd.f32 1e-05, %v178_v48 }
  0xff   :  { %1943 = vrsqrt.f32 %v182_v49  ;;  %v580_v49 = vpop.permute.xlu0 %579 }
 0x100   :  { %v1940_v50 = vpop.eup %1939 }
 0x101   :  { %v186_v51 = vmul.f32 %v1940_v50, %v2040_v15 }
 0x103   :  { %v198_v54 = vrot.slane %v186_v51, %v2044_v16 }
 0x104   :  { %v1942_v56 = vpop.eup %1941 }
 0x105   :  { %v210_v57 = vmul.f32 %v198_v54, %v189_v52  ;;  %v187_v60 = vmul.f32 %v1942_v56, %v2040_v15 }
 0x107   :  { %v221_v62 = vadd.f32 %v219_v55, %v210_v57  ;;  %v202_v29 = vrot.slane %v187_v60, %v2044_v16 }
 0x109   :  { %v1944_v2 = vpop.eup %1943  ;;  %v224_v3 = vmax.f32 %v221_v62, 0.0  ;;  %v211_v6 = vmul.f32 %v202_v29, %v190_v63 }
 0x10a   :  { %v188_v5 = vmul.f32 %v1944_v2, %v2040_v15  ;;  %v1894_v15 = vpack.c.bf16 %v572_v8, %v571_v7 }
 0x10b   :  { %1738 = vmatmul.mubr.msk.f32.vlgmr.msra.gmra.mrb[6].mxu1 %vm28_vm1, %v224_v3  ;;  %v222_v11 = vadd.f32 %v219_v55, %v211_v6 }
 0x10c   :  { %v206_v9 = vrot.slane %v188_v5, %v2044_v16  ;;  %1892 = vmatpush3.bf16.msra.mxu1 %v1891_v1  ;;  %1740 = vmatprep.mubr.msk.f32.mxu1 %vm1971_vm0, %v1972_v4 }
 0x10d   :  { %1893 = vmatprep.subr.bf16.mxu1 %v1970_v0  ;;  %v225_v13 = vmax.f32 %v222_v11, 0.0 }
 0x10e   :  { %v212_v12 = vmul.f32 %v206_v9, %v191_v39 }
 0x10f   :  { %1741 = vmatmul.mubr.msk.f32.gmra.mrb[8].mxu1 %vm28_vm1, %v225_v13 }
 0x110   :  { %v223_v14 = vadd.f32 %v219_v55, %v212_v12  ;;  %1895 = vmatpush3.bf16.msra.mxu1 %v1894_v15  ;;  %1743 = vmatprep.mubr.msk.f32.mxu1 %vm1971_vm0, %v1972_v4 }
 0x111   :  { %1902 = vmatprep.subr.bf16.mxu1 %v1970_v0 }
 0x112   :  { %v226_v53 = vmax.f32 %v223_v14, 0.0 }
 0x114   :  { %1744 = vmatmul.mubr.msk.f32.gmra.mrb[10].mxu1 %vm28_vm1, %v226_v53 }
 0x115   :  { %1771 = vmatprep.mubr.msk.f32.mxu1 %vm1971_vm0, %v1972_v4 }
 0x118   :  { %1772 = vmatmul.mubr.msk.f32.vlgmr.msra.gmra.mrb[12].mxu1 %vm28_vm1, %v2108_v34  ;;  %v2182_v34 = vrot.slane %v2176_v17, %v2044_v16 }
 0x119   :  { %1774 = vmatprep.mubr.msk.f32.mxu1 %vm1971_vm0, %v1972_v4 }
 0x11a   :  { %1048 = vrot.lane.b32.xlu1 %v2182_v34, %s1973_s8 }
 0x11c   :  { %1775 = vmatmul.mubr.msk.f32.gmra.mrb[14].mxu1 %vm28_vm1, %v2117_v46 }
 0x11d   :  { %1777 = vmatprep.mubr.msk.f32.mxu1 %vm1971_vm0, %v1972_v4 }
 0x120   :  { %1778 = vmatmul.mubr.msk.f32.gmra.mrb[16].mxu1 %vm28_vm1, %v2126_v61 }
 0x121   :  { %1805 = vmatprep.mubr.msk.f32.mxu1 %vm1971_vm0, %v1972_v4 }
 0x1de   :  { %v2186_v46 = vpop.f32.mrb[6].mxu1 }
 0x1df   :  { %v321_v61 = vsel %vm320_vm2, %v2186_v46, 0.0  ;;  %v345_v18 = vmul.f32 %v2186_v46, %v2186_v46  ;;  %v1739_v19 = vpop.f32.mrb[7].mxu1 }
 0x1e0   :  { %v322_v20 = vrot.slane %v321_v61, 4 }
 0x1e1   :  { %v348_v28 = vsel %vm320_vm2, %v345_v18, 0.0 }
 0x1e2   :  { %v323_v21 = vadd.f32 %v322_v20, %v321_v61  ;;  %v349_v22 = vrot.slane %v348_v28, 4  ;;  %v2193_v23 = vpop.f32.mrb[8].mxu1 }
 0x1e3   :  { %v328_v26 = vsel %vm320_vm2, %v2193_v23, 0.0  ;;  %v346_v27 = vmul.f32 %v2193_v23, %v2193_v23  ;;  %v1742_v30 = vpop.f32.mrb[9].mxu1 }
 0x1e4   :  { %v324_v24 = vrot.slane %v323_v21, 2  ;;  %v350_v25 = vadd.f32 %v349_v22, %v348_v28  ;;  %v329_v31 = vrot.slane %v328_v26, 4 }
 0x1e5   :  { %v355_v35 = vsel %vm320_vm2, %v346_v27, 0.0 }
 0x1e6   :  { %v325_v32 = vadd.f32 %v324_v24, %v323_v21  ;;  %v351_v33 = vrot.slane %v350_v25, 2  ;;  %v330_v36 = vadd.f32 %v329_v31, %v328_v26  ;;  %v356_v37 = vrot.slane %v355_v35, 4 }
 0x1e7   :  { %v2200_v38 = vpop.f32.mrb[10].mxu1 }
 0x1e8   :  { %v326_v40 = vrot.slane %v325_v32, 1  ;;  %v352_v41 = vadd.f32 %v351_v33, %v350_v25  ;;  %v335_v42 = vsel %vm320_vm2, %v2200_v38, 0.0  ;;  %v347_v43 = vmul.f32 %v2200_v38, %v2200_v38  ;;  %v1745_v44 = vpop.f32.mrb[11].mxu1 }
 0x1e9   :  { %v331_v45 = vrot.slane %v330_v36, 2  ;;  %v357_v47 = vadd.f32 %v356_v37, %v355_v35  ;;  %v336_v48 = vrot.slane %v335_v42, 4 }
 0x1ea   :  { %v327_v50 = vadd.f32 %v326_v40, %v325_v32  ;;  %v353_v51 = vrot.slane %v352_v41, 1  ;;  %v362_v52 = vsel %vm320_vm2, %v347_v43, 0.0  ;;  %v1976_v40 = vmov 1966171168  }
 0x1eb   :  { %v332_v54 = vadd.f32 %v331_v45, %v330_v36  ;;  %v358_v55 = vrot.slane %v357_v47, 2  ;;  %v337_v56 = vadd.f32 %v336_v48, %v335_v42  ;;  %v363_v57 = vrot.slane %v362_v52, 4  ;;  %v657_v58 = vpop.f32.mrb[12].mxu1 }
 0x1ec   :  { %v2207_v59 = vmul.f32 0.125, %v327_v50  ;;  %v354_v60 = vadd.f32 %v353_v51, %v352_v41  ;;  %v658_v62 = vadd.f32 %v657_v58, %v580_v49  ;;  %v1773_v63 = vpop.f32.mrb[13].mxu1  ;;  %v392_v41 = vunpack.c.l.s4 %v1976_v40 }
 0x1ed   :  { %v333_v29 = vrot.slane %v332_v54, 1  ;;  %v359_v1 = vadd.f32 %v358_v55, %v357_v47  ;;  %v338_v2 = vrot.slane %v337_v56, 2  ;;  %v364_v3 = vadd.f32 %v363_v57, %v362_v52 }
 0x1ee   :  { %v369_v5 = vmul.f32 0.125, %v354_v60  ;;  %v372_v6 = vmul.f32 %v2207_v59, %v2207_v59  ;;  %v671_v7 = vmax.f32 %v658_v62, 0.0  ;;  %v445_v8 = vsub.f32 %v2186_v46, %v2207_v59  ;;  %v763_v60 = vld [vmem:[%s2493_s2 + $0x60] sm:$0xff]  ;;  %v764_v62 = vld [vmem:[%s2493_s2 + $0x68] sm:$0xff] }
 0x1ef   :  { %v334_v39 = vadd.f32 %v333_v29, %v332_v54  ;;  %v360_v9 = vrot.slane %v359_v1, 1  ;;  %v339_v11 = vadd.f32 %v338_v2, %v337_v56  ;;  %v365_v15 = vrot.slane %v364_v3, 2  ;;  %v662_v12 = vpop.f32.mrb[14].mxu1  ;;  %v2256_v2 = vld [vmem:[%s2495_s3 + $0x2] sm:$0x1] }
 0x1f0   :  { %v375_v13 = vsub.f32 %v369_v5, %v372_v6  ;;  %v663_v14 = vadd.f32 %v662_v12, %v580_v49  ;;  %v1776_v53 = vpop.f32.mrb[15].mxu1  ;;  %1789 = vmatmul.mubr.msk.f32.vlgmr.msra.gmra.mrb[6].mxu0 %vm28_vm1, %v671_v7  ;;  %v393_v50 = vunpack.c.0.s8 %v392_v41  ;;  %v1903_v29 = vpack.c.bf16 %v764_v62, %v763_v60  ;;  %v1059_v62 = vld [vmem:[%s2493_s2 + $0xb0] sm:$0xff] }
 0x1f1   :  { %v2214_v61 = vmul.f32 0.125, %v334_v39  ;;  %v361_v18 = vadd.f32 %v360_v9, %v359_v1  ;;  %v340_v19 = vrot.slane %v339_v11, 1  ;;  %v366_v20 = vadd.f32 %v365_v15, %v364_v3  ;;  %1791 = vmatprep.mubr.msk.f32.mxu0 %vm1971_vm0, %v1972_v4  ;;  %v766_v1 = vld [vmem:[%s2493_s2 + $0x78] sm:$0xff] }
 0x1f2   :  { %v378_v28 = vmax.f32 %v375_v13, 0.0  ;;  %v672_v21 = vmax.f32 %v663_v14, 0.0  ;;  %v2235_v54 = vsub.s32 %v393_v50, %v2029_v10  ;;  %v765_v10 = vld [vmem:[%s2493_s2 + $0x70] sm:$0xff]  ;;  %1904 = vmatpush3.bf16.msra.mxu1 %v1903_v29  ;;  %v1249_v39 = vrot.slane %v2256_v2, %v2044_v16 }
 0x1f3   :  { %v370_v22 = vmul.f32 0.125, %v361_v18  ;;  %v373_v24 = vmul.f32 %v2214_v61, %v2214_v61  ;;  %v341_v25 = vadd.f32 %v340_v19, %v339_v11  ;;  %v367_v26 = vrot.slane %v366_v20, 1  ;;  %v667_v27 = vpop.f32.mrb[16].mxu1  ;;  %1905 = vmatprep.subr.bf16.mxu1 %v1970_v0  ;;  %v768_v11 = vpop.permute.xlu1 %767  ;;  %v862_v18 = vld [vmem:[%s2493_s2 + $0x80] sm:$0xff]  ;;  %v863_v19 = vld [vmem:[%s2493_s2 + $0x88] sm:$0xff] }
 0x1f4   :  { %v382_v30 = vadd.f32 1e-05, %v378_v28  ;;  %v668_v31 = vadd.f32 %v667_v27, %v580_v49  ;;  %v1779_v32 = vpop.f32.mrb[17].mxu1  ;;  %1792 = vmatmul.mubr.msk.f32.gmra.mrb[8].mxu0 %vm28_vm1, %v672_v21  ;;  %v446_v33 = vsub.f32 %v2193_v23, %v2214_v61  ;;  %v1906_v5 = vpack.c.bf16 %v766_v1, %v765_v10  ;;  %v865_v21 = vld [vmem:[%s2493_s2 + $0x98] sm:$0xff] }
 0x1f5   :  { %v376_v35 = vsub.f32 %v370_v22, %v373_v24  ;;  %v2223_v36 = vmul.f32 0.125, %v341_v25  ;;  %v368_v37 = vadd.f32 %v367_v26, %v366_v20  ;;  %1794 = vmatprep.mubr.msk.f32.mxu0 %vm1971_vm0, %v1972_v4  ;;  %v1909_v28 = vpack.c.bf16 %v863_v19, %v862_v18  ;;  %v1060_v10 = vld [vmem:[%s2493_s2 + $0xb8] sm:$0xff] }
 0x1f6   :  { %1945 = vrsqrt.f32 %v382_v30  ;;  %v673_v42 = vmax.f32 %v668_v31, 0.0  ;;  %1907 = vmatpush3.bf16.msra.mxu1 %v1906_v5 }
 0x1f7   :  { %v379_v43 = vmax.f32 %v376_v35, 0.0  ;;  %v371_v44 = vmul.f32 0.125, %v368_v37  ;;  %v374_v45 = vmul.f32 %v2223_v36, %v2223_v36  ;;  %v447_v47 = vsub.f32 %v2200_v38, %v2223_v36  ;;  %1914 = vmatprep.subr.bf16.mxu1 %v1970_v0  ;;  %v2268_v15 = vpop.permute.xlu1 %1048  ;;  %1910 = vmatpush3.bf16.msra.mxu0 %v1909_v28 }
 0x1f8   :  { %1795 = vmatmul.mubr.msk.f32.gmra.mrb[10].mxu0 %vm28_vm1, %v673_v42  ;;  %1911 = vmatprep.subr.bf16.mxu0 %v1970_v0 }
 0x1f9   :  { %v383_v48 = vadd.f32 1e-05, %v379_v43  ;;  %v377_v49 = vsub.f32 %v371_v44, %v374_v45  ;;  %1822 = vmatprep.mubr.msk.f32.mxu0 %vm1971_vm0, %v1972_v4 }
 0x1fb   :  { %1947 = vrsqrt.f32 %v383_v48  ;;  %v380_v51 = vmax.f32 %v377_v49, 0.0 }
 0x1fd   :  { %v384_v52 = vadd.f32 1e-05, %v380_v51 }
 0x1ff   :  { %1949 = vrsqrt.f32 %v384_v52 }
 0x200   :  { %v1946_v55 = vpop.eup %1945 }
 0x201   :  { %v397_v56 = vrot.slane %v1946_v55, %v2235_v54 }
 0x203   :  { %v404_v57 = vrot.slane %v397_v56, %v2235_v54 }
 0x205   :  { %v1948_v58 = vpop.eup %1947  ;;  %433 = vrot.lane.b32.xlu0 %v404_v57, %s1974_s22  ;;  %v1057_v57 = vld [vmem:[%s2493_s2 + $0xa0] sm:$0xff] }
 0x206   :  { %v411_v63 = vrot.slane %v1948_v58, %v2235_v54  ;;  %v1058_v58 = vld [vmem:[%s2493_s2 + $0xa8] sm:$0xff] }
 0x207   :  { %v1915_v60 = vpack.c.bf16 %v1058_v58, %v1057_v57 }
 0x208   :  { %v418_v3 = vrot.slane %v411_v63, %v2235_v54  ;;  %v1918_v63 = vpack.c.bf16 %v1060_v10, %v1059_v62 }
 0x209   :  { %v1950_v6 = vpop.eup %1949 }
 0x20a   :  { %435 = vrot.lane.b32.xlu1 %v418_v3, %s1974_s22  ;;  %v425_v7 = vrot.slane %v1950_v6, %v2235_v54 }
 0x20c   :  { %v432_v9 = vrot.slane %v425_v7, %v2235_v54 }
 0x20e   :  { %437 = vrot.lane.b32.xlu0 %v432_v9, %s1974_s22  ;;  %1250 = vrot.lane.b32.xlu1 %v1249_v39, %s1977_s17  ;;  %s1979_s17 = smov 16  }
 0x212   :  { %480 = vrot.lane.b32.xlu1 %v2182_v34, %s1978_s18  ;;  %v864_v34 = vld [vmem:[%s2493_s2 + $0x90] sm:$0xff] }
 0x213   :  { %v1912_v24 = vpack.c.bf16 %v865_v21, %v864_v34 }
 0x215   :  { %1913 = vmatpush3.bf16.msra.mxu0 %v1912_v24 }
 0x216   :  { %1848 = vmatprep.subr.mxu0 %v1972_v4 }
 0x277   :  { %v434_v12 = vpop.permute.xlu0 %433 }
 0x278   :  { %v442_v13 = vmul.f32 %v434_v12, %v2176_v17 }
 0x27a   :  { %v454_v14 = vrot.slane %v442_v13, %v2044_v16 }
 0x27c   :  { %v436_v53 = vpop.permute.xlu1 %435  ;;  %463 = vrot.lane.b32.xlu0 %v454_v14, %s1974_s22 }
 0x27d   :  { %v443_v20 = vmul.f32 %v436_v53, %v2176_v17 }
 0x27f   :  { %v458_v22 = vrot.slane %v443_v20, %v2044_v16 }
 0x280   :  { %v438_v25 = vpop.permute.xlu0 %437 }
 0x281   :  { %v444_v26 = vmul.f32 %v438_v25, %v2176_v17  ;;  %465 = vrot.lane.b32.xlu0 %v458_v22, %s1974_s22 }
 0x283   :  { %v462_v27 = vrot.slane %v444_v26, %v2044_v16 }
 0x285   :  { %467 = vrot.lane.b32.xlu1 %v462_v27, %s1974_s22 }
 0x2c3   :  { %v749_v30 = vpop.f32.mrb[6].mxu0 }
 0x2c4   :  { %v1790_v31 = vpop.f32.mrb[7].mxu0  ;;  %1806 = vmatmul.mubr.msk.f32.vlgmr.msra.gmra.mrb[18].mxu1 %vm28_vm1, %v749_v30 }
 0x2c5   :  { %1808 = vmatprep.mubr.msk.f32.mxu1 %vm1971_vm0, %v1972_v4  ;;  %1916 = vmatpush3.bf16.msra.mxu1 %v1915_v60 }
 0x2c6   :  { %1917 = vmatprep.subr.bf16.mxu1 %v1970_v0 }
 0x2c7   :  { %v754_v32 = vpop.f32.mrb[8].mxu0 }
 0x2c8   :  { %v1793_v35 = vpop.f32.mrb[9].mxu0  ;;  %1809 = vmatmul.mubr.msk.f32.gmra.mrb[20].mxu1 %vm28_vm1, %v754_v32 }
 0x2c9   :  { %1811 = vmatprep.mubr.msk.f32.mxu1 %vm1971_vm0, %v1972_v4  ;;  %1919 = vmatpush3.bf16.msra.mxu1 %v1918_v63 }
 0x2cb   :  { %v759_v37 = vpop.f32.mrb[10].mxu0 }
 0x2cc   :  { %v1796_v40 = vpop.f32.mrb[11].mxu0  ;;  %1812 = vmatmul.mubr.msk.f32.gmra.mrb[22].mxu1 %vm28_vm1, %v759_v37 }
 0x2cd   :  { %1839 = vmatprep.mubr.msk.f32.mxu1 %vm1971_vm0, %v1972_v4 }
 0x397   :  { %v845_v41 = vpop.f32.mrb[18].mxu1 }
 0x398   :  { %v846_v42 = vadd.f32 %v845_v41, %v768_v11  ;;  %v1807_v43 = vpop.f32.mrb[19].mxu1 }
 0x39a   :  { %v859_v44 = vmax.f32 %v846_v42, 0.0 }
 0x39b   :  { %v850_v45 = vpop.f32.mrb[20].mxu1 }
 0x39c   :  { %v851_v48 = vadd.f32 %v850_v45, %v768_v11  ;;  %v1810_v49 = vpop.f32.mrb[21].mxu1  ;;  %1823 = vmatmul.mubr.msk.f32.vlgmr.msra.gmra.mrb[12].mxu0 %vm28_vm1, %v859_v44 }
 0x39d   :  { %1825 = vmatprep.mubr.msk.f32.mxu0 %vm1971_vm0, %v1972_v4 }
 0x39e   :  { %v860_v50 = vmax.f32 %v851_v48, 0.0 }
 0x39f   :  { %v855_v51 = vpop.f32.mrb[22].mxu1 }
 0x3a0   :  { %v856_v52 = vadd.f32 %v855_v51, %v768_v11  ;;  %v1813_v55 = vpop.f32.mrb[23].mxu1  ;;  %1826 = vmatmul.mubr.msk.f32.gmra.mrb[14].mxu0 %vm28_vm1, %v860_v50 }
 0x3a1   :  { %1828 = vmatprep.mubr.msk.f32.mxu0 %vm1971_vm0, %v1972_v4 }
 0x3a2   :  { %v861_v56 = vmax.f32 %v856_v52, 0.0 }
 0x3a4   :  { %1829 = vmatmul.mubr.msk.f32.gmra.mrb[16].mxu0 %vm28_vm1, %v861_v56 }
 0x3a5   :  { %1850 = vmatprep.mubr.msk.f32.mxu0 %vm1971_vm0, %v1972_v4 }
 0x46f   :  { %v2324_v29 = vpop.f32.mrb[12].mxu0 }
 0x470   :  { %v955_v1 = vsel %vm28_vm1, %v2324_v29, 0.0  ;;  %v979_v3 = vmul.f32 %v2324_v29, %v2324_v29  ;;  %v1824_v5 = vpop.f32.mrb[13].mxu0 }
 0x471   :  { %v956_v6 = vrot.slane %v955_v1, 4 }
 0x472   :  { %v982_v7 = vsel %vm28_vm1, %v979_v3, 0.0 }
 0x473   :  { %v957_v39 = vadd.f32 %v956_v6, %v955_v1  ;;  %v983_v9 = vrot.slane %v982_v7, 4  ;;  %v2331_v11 = vpop.f32.mrb[14].mxu0 }
 0x474   :  { %v962_v12 = vsel %vm28_vm1, %v2331_v11, 0.0  ;;  %v980_v13 = vmul.f32 %v2331_v11, %v2331_v11  ;;  %v1827_v14 = vpop.f32.mrb[15].mxu0 }
 0x475   :  { %v958_v53 = vrot.slane %v957_v39, 2  ;;  %v984_v18 = vadd.f32 %v983_v9, %v982_v7  ;;  %v963_v19 = vrot.slane %v962_v12, 4 }
 0x476   :  { %v989_v34 = vsel %vm28_vm1, %v980_v13, 0.0 }
 0x477   :  { %v959_v20 = vadd.f32 %v958_v53, %v957_v39  ;;  %v985_v28 = vrot.slane %v984_v18, 2  ;;  %v964_v21 = vadd.f32 %v963_v19, %v962_v12  ;;  %v990_v22 = vrot.slane %v989_v34, 4  ;;  %v2338_v24 = vpop.f32.mrb[16].mxu0 }
 0x478   :  { %v969_v25 = vsel %vm28_vm1, %v2338_v24, 0.0  ;;  %v981_v26 = vmul.f32 %v2338_v24, %v2338_v24  ;;  %v1830_v27 = vpop.f32.mrb[17].mxu0 }
 0x479   :  { %v960_v30 = vrot.slane %v959_v20, 1  ;;  %v986_v31 = vadd.f32 %v985_v28, %v984_v18  ;;  %v965_v32 = vrot.slane %v964_v21, 2  ;;  %v991_v35 = vadd.f32 %v990_v22, %v989_v34 }
 0x47a   :  { %v970_v37 = vrot.slane %v969_v25, 4  ;;  %v996_v40 = vsel %vm28_vm1, %v981_v26, 0.0 }
 0x47b   :  { %v961_v41 = vadd.f32 %v960_v30, %v959_v20  ;;  %v987_v42 = vrot.slane %v986_v31, 1  ;;  %v966_v43 = vadd.f32 %v965_v32, %v964_v21  ;;  %v992_v44 = vrot.slane %v991_v35, 2 }
 0x47c   :  { %v971_v45 = vadd.f32 %v970_v37, %v969_v25  ;;  %v997_v48 = vrot.slane %v996_v40, 4 }
 0x47d   :  { %v976_v49 = vmul.f32 0.125, %v961_v41  ;;  %v988_v50 = vadd.f32 %v987_v42, %v986_v31  ;;  %v967_v51 = vrot.slane %v966_v43, 1  ;;  %v993_v52 = vadd.f32 %v992_v44, %v991_v35 }
 0x47e   :  { %v972_v55 = vrot.slane %v971_v45, 2  ;;  %v998_v56 = vadd.f32 %v997_v48, %v996_v40 }
 0x47f   :  { %v1003_v57 = vmul.f32 0.125, %v988_v50  ;;  %v1006_v58 = vmul.f32 %v976_v49, %v976_v49  ;;  %v968_v60 = vadd.f32 %v967_v51, %v966_v43  ;;  %v994_v62 = vrot.slane %v993_v52, 1 }
 0x480   :  { %v973_v10 = vadd.f32 %v972_v55, %v971_v45  ;;  %v999_v63 = vrot.slane %v998_v56, 2  ;;  %v1024_v32 = vsub.f32 %v2324_v29, %v976_v49 }
 0x481   :  { %v1009_v1 = vsub.f32 %v1003_v57, %v1006_v58  ;;  %v977_v3 = vmul.f32 0.125, %v968_v60  ;;  %v995_v5 = vadd.f32 %v994_v62, %v993_v52 }
 0x482   :  { %v974_v6 = vrot.slane %v973_v10, 1  ;;  %v1000_v7 = vadd.f32 %v999_v63, %v998_v56 }
 0x483   :  { %v1012_v39 = vmax.f32 %v1009_v1, 0.0  ;;  %v1007_v9 = vmul.f32 %v977_v3, %v977_v3  ;;  %v1004_v12 = vmul.f32 0.125, %v995_v5  ;;  %v1025_v43 = vsub.f32 %v2331_v11, %v977_v3 }
 0x484   :  { %v975_v13 = vadd.f32 %v974_v6, %v973_v10  ;;  %v1001_v14 = vrot.slane %v1000_v7, 1 }
 0x485   :  { %v1015_v53 = vadd.f32 1e-05, %v1012_v39  ;;  %v1010_v18 = vsub.f32 %v1004_v12, %v1007_v9 }
 0x486   :  { %v978_v19 = vmul.f32 0.125, %v975_v13  ;;  %v1002_v34 = vadd.f32 %v1001_v14, %v1000_v7 }
 0x487   :  { %1951 = vrsqrt.f32 %v1015_v53  ;;  %v1013_v20 = vmax.f32 %v1010_v18, 0.0 }
 0x488   :  { %v1005_v28 = vmul.f32 0.125, %v1002_v34  ;;  %v1008_v21 = vmul.f32 %v978_v19, %v978_v19  ;;  %v1026_v49 = vsub.f32 %v2338_v24, %v978_v19  ;;  %v1261_v24 = vld [vmem:[%s2493_s2 + $0xd0] sm:$0xff] }
 0x489   :  { %v1016_v22 = vadd.f32 1e-05, %v1013_v20  ;;  %1849 = vmatpush3.msra.mxu0 %v1261_v24 }
 0x48a   :  { %v1011_v25 = vsub.f32 %v1005_v28, %v1008_v21  ;;  %1920 = vmatprep.subr.bf16.mxu0 %v1970_v0 }
 0x48b   :  { %1953 = vrsqrt.f32 %v1016_v22 }
 0x48c   :  { %v1014_v26 = vmax.f32 %v1011_v25, 0.0 }
 0x48e   :  { %v1017_v27 = vadd.f32 1e-05, %v1014_v26 }
 0x490   :  { %1955 = vrsqrt.f32 %v1017_v27 }
 0x491   :  { %v1952_v30 = vpop.eup %1951 }
 0x492   :  { %v1021_v31 = vmul.f32 %v1952_v30, %v2176_v17 }
 0x494   :  { %v1033_v35 = vrot.slane %v1021_v31, %v2044_v16 }
 0x495   :  { %v1954_v37 = vpop.eup %1953 }
 0x496   :  { %v1045_v40 = vmul.f32 %v1033_v35, %v1024_v32  ;;  %v1022_v41 = vmul.f32 %v1954_v37, %v2176_v17 }
 0x498   :  { %v1051_v42 = vadd.f32 %v2268_v15, %v1045_v40  ;;  %v1037_v44 = vrot.slane %v1022_v41, %v2044_v16 }
 0x49a   :  { %v1956_v45 = vpop.eup %1955  ;;  %v1054_v48 = vmax.f32 %v1051_v42, 0.0  ;;  %v1046_v50 = vmul.f32 %v1037_v44, %v1025_v43 }
 0x49b   :  { %v1023_v51 = vmul.f32 %v1956_v45, %v2176_v17 }
 0x49c   :  { %1840 = vmatmul.mubr.msk.f32.vlgmr.msra.gmra.mrb[24].mxu1 %vm28_vm1, %v1054_v48  ;;  %v1052_v29 = vadd.f32 %v2268_v15, %v1046_v50 }
 0x49d   :  { %v1041_v52 = vrot.slane %v1023_v51, %v2044_v16  ;;  %1842 = vmatprep.mubr.msk.f32.mxu1 %vm1971_vm0, %v1972_v4 }
 0x49e   :  { %v1055_v11 = vmax.f32 %v1052_v29, 0.0 }
 0x49f   :  { %v1047_v55 = vmul.f32 %v1041_v52, %v1026_v49 }
 0x4a0   :  { %1843 = vmatmul.mubr.msk.f32.gmra.mrb[26].mxu1 %vm28_vm1, %v1055_v11 }
 0x4a1   :  { %v1053_v56 = vadd.f32 %v2268_v15, %v1047_v55  ;;  %1845 = vmatprep.mubr.msk.f32.mxu1 %vm1971_vm0, %v1972_v4 }
 0x4a3   :  { %v1056_v57 = vmax.f32 %v1053_v56, 0.0 }
 0x4a5   :  { %1846 = vmatmul.mubr.msk.f32.gmra.mrb[28].mxu1 %vm28_vm1, %v1056_v57 }
 0x56f   :  { %v2368_v58 = vpop.f32.mrb[24].mxu1 }
 0x570   :  { %v1151_v15 = vsel %vm1150_vm3, %v2368_v58, 0.0  ;;  %v1175_v60 = vmul.f32 %v2368_v58, %v2368_v58  ;;  %v1841_v62 = vpop.f32.mrb[25].mxu1 }
 0x571   :  { %v1152_v10 = vrot.slane %v1151_v15, 4 }
 0x572   :  { %v1178_v63 = vsel %vm1150_vm3, %v1175_v60, 0.0 }
 0x573   :  { %v1153_v1 = vadd.f32 %v1152_v10, %v1151_v15  ;;  %v1179_v3 = vrot.slane %v1178_v63, 4  ;;  %v2375_v5 = vpop.f32.mrb[26].mxu1 }
 0x574   :  { %v1158_v0 = vsel %vm1150_vm3, %v2375_v5, 0.0  ;;  %v1176_v39 = vmul.f32 %v2375_v5, %v2375_v5  ;;  %v1844_v9 = vpop.f32.mrb[27].mxu1 }
 0x575   :  { %v1154_v6 = vrot.slane %v1153_v1, 2  ;;  %v1180_v7 = vadd.f32 %v1179_v3, %v1178_v63  ;;  %v1159_v12 = vrot.slane %v1158_v0, 4 }
 0x576   :  { %v1185_v53 = vsel %vm1150_vm3, %v1176_v39, 0.0 }
 0x577   :  { %v1155_v13 = vadd.f32 %v1154_v6, %v1153_v1  ;;  %v1181_v14 = vrot.slane %v1180_v7, 2  ;;  %v1160_v18 = vadd.f32 %v1159_v12, %v1158_v0  ;;  %v1186_v19 = vrot.slane %v1185_v53, 4 }
 0x578   :  { %v2382_v34 = vpop.f32.mrb[28].mxu1 }
 0x579   :  { %v1156_v20 = vrot.slane %v1155_v13, 1  ;;  %v1182_v28 = vadd.f32 %v1181_v14, %v1180_v7  ;;  %v1165_v21 = vsel %vm1150_vm3, %v2382_v34, 0.0  ;;  %v1177_v22 = vmul.f32 %v2382_v34, %v2382_v34  ;;  %v1847_v25 = vpop.f32.mrb[29].mxu1 }
 0x57a   :  { %v1161_v26 = vrot.slane %v1160_v18, 2  ;;  %v1187_v27 = vadd.f32 %v1186_v19, %v1185_v53  ;;  %v1166_v30 = vrot.slane %v1165_v21, 4 }
 0x57b   :  { %v1157_v31 = vadd.f32 %v1156_v20, %v1155_v13  ;;  %v1183_v32 = vrot.slane %v1182_v28, 1  ;;  %v1192_v35 = vsel %vm1150_vm3, %v1177_v22, 0.0 }
 0x57c   :  { %v1162_v37 = vadd.f32 %v1161_v26, %v1160_v18  ;;  %v1188_v40 = vrot.slane %v1187_v27, 2  ;;  %v1167_v41 = vadd.f32 %v1166_v30, %v1165_v21  ;;  %v1193_v42 = vrot.slane %v1192_v35, 4  ;;  %v1259_v30 = vld [vmem:[%s2493_s2 + $0xc0] sm:$0xff] }
 0x57d   :  { %v1172_v43 = vmul.f32 0.125, %v1157_v31  ;;  %v1184_v44 = vadd.f32 %v1183_v32, %v1182_v28  ;;  %v1260_v31 = vld [vmem:[%s2493_s2 + $0xc8] sm:$0xff]  ;;  %v1251_v32 = vpop.permute.xlu1 %1250 }
 0x57e   :  { %v1163_v45 = vrot.slane %v1162_v37, 1  ;;  %v1189_v48 = vadd.f32 %v1188_v40, %v1187_v27  ;;  %v1168_v50 = vrot.slane %v1167_v41, 2  ;;  %v1194_v51 = vadd.f32 %v1193_v42, %v1192_v35 }
 0x57f   :  { %v1199_v29 = vmul.f32 0.125, %v1184_v44  ;;  %v1202_v49 = vmul.f32 %v1172_v43, %v1172_v43  ;;  %v1221_v22 = vsub.f32 %v2368_v58, %v1172_v43  ;;  %v464_v44 = vpop.permute.xlu0 %463 }
 0x580   :  { %v1164_v52 = vadd.f32 %v1163_v45, %v1162_v37  ;;  %v1190_v55 = vrot.slane %v1189_v48, 1  ;;  %v1169_v11 = vadd.f32 %v1168_v50, %v1167_v41  ;;  %v1195_v56 = vrot.slane %v1194_v51, 2 }
 0x581   :  { %v1205_v57 = vsub.f32 %v1199_v29, %v1202_v49  ;;  %v1921_v41 = vpack.c.bf16 %v1260_v31, %v1259_v30  ;;  %v472_v49 = vmul.f32 %v464_v44, %v445_v8 }
 0x582   :  { %v1173_v24 = vmul.f32 0.125, %v1164_v52  ;;  %v1191_v15 = vadd.f32 %v1190_v55, %v1189_v48  ;;  %v1170_v60 = vrot.slane %v1169_v11, 1  ;;  %v1196_v62 = vadd.f32 %v1195_v56, %v1194_v51  ;;  %v481_v55 = vpop.permute.xlu1 %480 }
 0x583   :  { %v1208_v10 = vmax.f32 %v1205_v57, 0.0  ;;  %v483_v56 = vadd.f32 %v481_v55, %v472_v49 }
 0x584   :  { %v1200_v63 = vmul.f32 0.125, %v1191_v15  ;;  %v1203_v1 = vmul.f32 %v1173_v24, %v1173_v24  ;;  %v1171_v3 = vadd.f32 %v1170_v60, %v1169_v11  ;;  %v1197_v7 = vrot.slane %v1196_v62, 1  ;;  %v466_v11 = vpop.permute.xlu0 %465 }
 0x585   :  { %v1212_v6 = vadd.f32 1e-05, %v1208_v10  ;;  %v1222_v40 = vsub.f32 %v2375_v5, %v1173_v24  ;;  %v486_v46 = vmax.f32 %v483_v56, 0.0 }
 0x586   :  { %v1206_v0 = vsub.f32 %v1200_v63, %v1203_v1  ;;  %v1174_v39 = vmul.f32 0.125, %v1171_v3  ;;  %v1198_v9 = vadd.f32 %v1197_v7, %v1196_v62  ;;  %v468_v24 = vpop.permute.xlu1 %467 }
 0x587   :  { %1957 = vrsqrt.f32 %v1212_v6  ;;  %v474_v8 = vmul.f32 %v468_v24, %v447_v47 }
 0x588   :  { %v1209_v12 = vmax.f32 %v1206_v0, 0.0  ;;  %v1204_v13 = vmul.f32 %v1174_v39, %v1174_v39  ;;  %v1201_v14 = vmul.f32 0.125, %v1198_v9  ;;  %v1223_v51 = vsub.f32 %v2382_v34, %v1174_v39 }
 0x589   :  { %v473_v34 = vmul.f32 %v466_v11, %v446_v33  ;;  %v485_v61 = vadd.f32 %v481_v55, %v474_v8 }
 0x58a   :  { %v1213_v53 = vadd.f32 1e-05, %v1209_v12  ;;  %v1207_v18 = vsub.f32 %v1201_v14, %v1204_v13 }
 0x58b   :  { %v484_v59 = vadd.f32 %v481_v55, %v473_v34  ;;  %v488_v33 = vmax.f32 %v485_v61, 0.0 }
 0x58c   :  { %1959 = vrsqrt.f32 %v1213_v53  ;;  %v1210_v19 = vmax.f32 %v1207_v18, 0.0 }
 0x58d   :  { %v487_v23 = vmax.f32 %v484_v59, 0.0 }
 0x58e   :  { %v1214_v20 = vadd.f32 1e-05, %v1210_v19 }
 0x590   :  { %1961 = vrsqrt.f32 %v1214_v20 }
 0x591   :  { %v1958_v28 = vpop.eup %1957 }
 0x592   :  { %v1218_v21 = vmul.f32 %v1958_v28, %v2256_v2 }
 0x594   :  { %v1230_v25 = vrot.slane %v1218_v21, %v2044_v16 }
 0x596   :  { %v1960_v26 = vpop.eup %1959  ;;  %v1242_v27 = vmul.f32 %v1230_v25, %v1221_v22 }
 0x597   :  { %v1219_v35 = vmul.f32 %v1960_v26, %v2256_v2 }
 0x598   :  { %v1253_v37 = vadd.f32 %v1251_v32, %v1242_v27 }
 0x599   :  { %v1234_v58 = vrot.slane %v1219_v35, %v2044_v16 }
 0x59a   :  { %v1256_v42 = vmax.f32 %v1253_v37, 0.0  ;;  %v1962_v43 = vpop.eup %1961 }
 0x59b   :  { %v1243_v45 = vmul.f32 %v1234_v58, %v1222_v40  ;;  %v1220_v48 = vmul.f32 %v1962_v43, %v2256_v2 }
 0x59c   :  { %1851 = vmatmul.mubr.msk.f32.vlgmr.msra.gmra.mrb[18].mxu0 %vm1150_vm3, %v1256_v42 }
 0x59d   :  { %v1254_v50 = vadd.f32 %v1251_v32, %v1243_v45  ;;  %1922 = vmatpush3.bf16.msra.mxu0 %v1921_v41  ;;  %1853 = vmatprep.mubr.msk.f32.mxu0 %vm1971_vm0, %v1972_v4  ;;  %v1238_v5 = vrot.slane %v1220_v48, %v2044_v16 }
 0x59f   :  { %v1257_v29 = vmax.f32 %v1254_v50, 0.0  ;;  %v1244_v52 = vmul.f32 %v1238_v5, %v1223_v51 }
 0x5a1   :  { %1854 = vmatmul.mubr.msk.f32.gmra.mrb[20].mxu0 %vm1150_vm3, %v1257_v29  ;;  %v1255_v2 = vadd.f32 %v1251_v32, %v1244_v52 }
 0x5a2   :  { %1856 = vmatprep.mubr.msk.f32.mxu0 %vm1971_vm0, %v1972_v4 }
 0x5a3   :  { %v1258_v57 = vmax.f32 %v1255_v2, 0.0 }
 0x5a5   :  { %1857 = vmatmul.mubr.msk.f32.gmra.mrb[22].mxu0 %vm1150_vm3, %v1258_v57 }
 0x5a6   :  { %1863 = vmatprep.mubr.msk.f32.mxu0 %vm1971_vm0, %v1972_v4 }
 0x5a9   :  { %1864 = vmatmul.mubr.msk.f32.vlgmr.msra.gmra.mrb[18].mxu0 %vm320_vm2, %v486_v46 }
 0x5aa   :  { %1866 = vmatprep.mubr.msk.f32.mxu0 %vm1971_vm0, %v1972_v4 }
 0x5ad   :  { %1867 = vmatmul.mubr.msk.f32.gmra.mrb[20].mxu0 %vm320_vm2, %v487_v23 }
 0x5ae   :  { %1869 = vmatprep.mubr.msk.f32.mxu0 %vm1971_vm0, %v1972_v4 }
 0x5b1   :  { %1870 = vmatmul.mubr.msk.f32.gmra.mrb[22].mxu0 %vm320_vm2, %v488_v33 }
 0x67c   :  { %v2429_v15 = vpop.f32.mrb[18].mxu0 }
 0x67d   :  { %v1440_v38 = vsel %vm320_vm2, %v2429_v15, 0.0  ;;  %v1464_v36 = vmul.f32 %v2429_v15, %v2429_v15  ;;  %v1865_v47 = vpop.f32.mrb[19].mxu0 }
 0x67e   :  { %v1441_v60 = vrot.slane %v1440_v38, 4 }
 0x67f   :  { %v1467_v62 = vsel %vm320_vm2, %v1464_v36, 0.0 }
 0x680   :  { %v1442_v10 = vadd.f32 %v1441_v60, %v1440_v38  ;;  %v1468_v63 = vrot.slane %v1467_v62, 4  ;;  %v2436_v1 = vpop.f32.mrb[20].mxu0 }
 0x681   :  { %v1447_v4 = vsel %vm320_vm2, %v2436_v1, 0.0  ;;  %v1465_v3 = vmul.f32 %v2436_v1, %v2436_v1  ;;  %v1868_v6 = vpop.f32.mrb[21].mxu0 }
 0x682   :  { %v1443_v7 = vrot.slane %v1442_v10, 2  ;;  %v1469_v0 = vadd.f32 %v1468_v63, %v1467_v62  ;;  %v1448_v39 = vrot.slane %v1447_v4, 4 }
 0x683   :  { %v1474_v9 = vsel %vm320_vm2, %v1465_v3, 0.0 }
 0x684   :  { %v1444_v12 = vadd.f32 %v1443_v7, %v1442_v10  ;;  %v1470_v13 = vrot.slane %v1469_v0, 2  ;;  %v1449_v14 = vadd.f32 %v1448_v39, %v1447_v4  ;;  %v1475_v53 = vrot.slane %v1474_v9, 4  ;;  %v2443_v18 = vpop.f32.mrb[22].mxu0 }
 0x685   :  { %v1454_v19 = vsel %vm320_vm2, %v2443_v18, 0.0  ;;  %v1466_v20 = vmul.f32 %v2443_v18, %v2443_v18  ;;  %v1871_v28 = vpop.f32.mrb[23].mxu0 }
 0x686   :  { %v1445_v21 = vrot.slane %v1444_v12, 1  ;;  %v1471_v22 = vadd.f32 %v1470_v13, %v1469_v0  ;;  %v1450_v25 = vrot.slane %v1449_v14, 2  ;;  %v1476_v26 = vadd.f32 %v1475_v53, %v1474_v9 }
 0x687   :  { %v1455_v27 = vrot.slane %v1454_v19, 4  ;;  %v1481_v30 = vsel %vm320_vm2, %v1466_v20, 0.0 }
 0x688   :  { %v1446_v31 = vadd.f32 %v1445_v21, %v1444_v12  ;;  %v1472_v32 = vrot.slane %v1471_v22, 1  ;;  %v1451_v35 = vadd.f32 %v1450_v25, %v1449_v14  ;;  %v1477_v37 = vrot.slane %v1476_v26, 2 }
 0x689   :  { %v1456_v40 = vadd.f32 %v1455_v27, %v1454_v19  ;;  %v1482_v58 = vrot.slane %v1481_v30, 4  ;;  %v1646_v27 = vld [vmem:[%s2495_s3 + $0x1] ss:$0 sm:$0xff] }
 0x68a   :  { %v2450_v41 = vmul.f32 0.125, %v1446_v31  ;;  %v1473_v42 = vadd.f32 %v1472_v32, %v1471_v22  ;;  %v1452_v43 = vrot.slane %v1451_v35, 1  ;;  %v1478_v44 = vadd.f32 %v1477_v37, %v1476_v26 }
 0x68b   :  { %v1457_v45 = vrot.slane %v1456_v40, 2  ;;  %v1483_v48 = vadd.f32 %v1482_v58, %v1481_v30 }
 0x68c   :  { %v1488_v50 = vmul.f32 0.125, %v1473_v42  ;;  %v1491_v51 = vmul.f32 %v2450_v41, %v2450_v41  ;;  %v1453_v5 = vadd.f32 %v1452_v43, %v1451_v35  ;;  %v1479_v29 = vrot.slane %v1478_v44, 1 }
 0x68d   :  { %v1458_v49 = vadd.f32 %v1457_v45, %v1456_v40  ;;  %v1484_v52 = vrot.slane %v1483_v48, 2  ;;  %v1563_v55 = vsub.f32 %v2429_v15, %v2450_v41 }
 0x68e   :  { %v1494_v11 = vsub.f32 %v1488_v50, %v1491_v51  ;;  %v1462_v2 = vmul.f32 0.125, %v1453_v5  ;;  %v1480_v56 = vadd.f32 %v1479_v29, %v1478_v44 }
 0x68f   :  { %v1459_v34 = vrot.slane %v1458_v49, 1  ;;  %v1485_v57 = vadd.f32 %v1484_v52, %v1483_v48 }
 0x690   :  { %v1497_v24 = vmax.f32 %v1494_v11, 0.0  ;;  %v1489_v46 = vmul.f32 0.125, %v1480_v56  ;;  %v1492_v59 = vmul.f32 %v1462_v2, %v1462_v2  ;;  %v1564_v8 = vsub.f32 %v2436_v1, %v1462_v2 }
 0x691   :  { %v1460_v23 = vadd.f32 %v1459_v34, %v1458_v49  ;;  %v1486_v61 = vrot.slane %v1485_v57, 1 }
 0x692   :  { %v1500_v33 = vadd.f32 1e-05, %v1497_v24  ;;  %v1495_v38 = vsub.f32 %v1489_v46, %v1492_v59 }
 0x693   :  { %v1463_v36 = vmul.f32 0.125, %v1460_v23  ;;  %v1487_v47 = vadd.f32 %v1486_v61, %v1485_v57 }
 0x694   :  { %1963 = vrsqrt.f32 %v1500_v33  ;;  %v1498_v60 = vmax.f32 %v1495_v38, 0.0 }
 0x695   :  { %v1490_v62 = vmul.f32 0.125, %v1487_v47  ;;  %v1493_v15 = vmul.f32 %v1463_v36, %v1463_v36  ;;  %v1565_v10 = vsub.f32 %v2443_v18, %v1463_v36 }
 0x696   :  { %v1501_v63 = vadd.f32 1e-05, %v1498_v60 }
 0x697   :  { %v1496_v4 = vsub.f32 %v1490_v62, %v1493_v15 }
 0x698   :  { %1965 = vrsqrt.f32 %v1501_v63 }
 0x699   :  { %v1499_v3 = vmax.f32 %v1496_v4, 0.0 }
 0x69b   :  { %v1502_v6 = vadd.f32 1e-05, %v1499_v3 }
 0x69d   :  { %1967 = vrsqrt.f32 %v1502_v6 }
 0x69e   :  { %v1964_v7 = vpop.eup %1963 }
 0x69f   :  { %v1515_v1 = vrot.slane %v1964_v7, %v2235_v54 }
 0x6a1   :  { %v1522_v0 = vrot.slane %v1515_v1, %v2235_v54 }
 0x6a2   :  { %v1966_v39 = vpop.eup %1965 }
 0x6a3   :  { %1551 = vrot.lane.b32.xlu0 %v1522_v0, %s1973_s8  ;;  %v1529_v9 = vrot.slane %v1966_v39, %v2235_v54 }
 0x6a5   :  { %v1536_v12 = vrot.slane %v1529_v9, %v2235_v54 }
 0x6a7   :  { %v1968_v13 = vpop.eup %1967  ;;  %1553 = vrot.lane.b32.xlu1 %v1536_v12, %s1973_s8 }
 0x6a8   :  { %v1543_v14 = vrot.slane %v1968_v13, %v2235_v54 }
 0x6aa   :  { %v1550_v53 = vrot.slane %v1543_v14, %v2235_v54  ;;  %v1969_v54 = vld [vmem:[%s2495_s3 + $0x1] sm:$0x1] }
 0x6ac   :  { %1555 = vrot.lane.b32.xlu0 %v1550_v53, %s1973_s8 }
 0x715   :  { %v1552_v18 = vpop.permute.xlu0 %1551 }
 0x716   :  { %v1560_v19 = vmul.f32 %v1552_v18, %v2176_v17 }
 0x718   :  { %v1572_v20 = vrot.slane %v1560_v19, %v2044_v16 }
 0x719   :  { %v1554_v28 = vpop.permute.xlu1 %1553 }
 0x71a   :  { %v1561_v21 = vmul.f32 %v1554_v28, %v2176_v17  ;;  %1581 = vrot.lane.b32.xlu1 %v1572_v20, %s1975_s7 }
 0x71c   :  { %v1576_v22 = vrot.slane %v1561_v21, %v2044_v16 }
 0x71e   :  { %v1556_v25 = vpop.permute.xlu0 %1555  ;;  %1583 = vrot.lane.b32.xlu0 %v1576_v22, %s1975_s7 }
 0x71f   :  { %v1562_v26 = vmul.f32 %v1969_v54, %v1556_v25 }
 0x721   :  { %v1580_v30 = vrot.slane %v1562_v26, %v2044_v16 }
 0x722   :  { %1599 = vrot.lane.b32.xlu0 %v1646_v27, %s1979_s17 }
 0x723   :  { %1585 = vrot.lane.b32.xlu1 %v1580_v30, %s1975_s7 }
 0x78c   :  { %v1582_v17 = vpop.permute.xlu1 %1581 }
 0x78d   :  { %v1590_v32 = vmul.f32 %v1582_v17, %v1563_v55 }
 0x790   :  { %v1584_v31 = vpop.permute.xlu0 %1583 }
 0x791   :  { %v1591_v35 = vmul.f32 %v1584_v31, %v1564_v8 }
 0x794   :  { %v1600_v37 = vpop.permute.xlu0 %1599 }
 0x795   :  { %v1586_v40 = vpop.permute.xlu1 %1585  ;;  %v1602_v58 = vadd.f32 %v1600_v37, %v1590_v32  ;;  %v1603_v41 = vadd.f32 %v1600_v37, %v1591_v35 }
 0x796   :  { %v1592_v42 = vmul.f32 %v1586_v40, %v1565_v10 }
 0x797   :  { %v1605_v43 = vmax.f32 %v1602_v58, 0.0  ;;  %v1606_v44 = vmax.f32 %v1603_v41, 0.0 }
 0x798   :  { %v1604_v45 = vadd.f32 %v1600_v37, %v1592_v42 }
 0x799   :  { %1608 = vst.msk [vmem:[%s2497_s4] sm:$0xff] %vm320_vm2, %v1605_v43  ;;  %1609 = vst.msk [vmem:[%s2497_s4 + $0x8] sm:$0xff] %vm320_vm2, %v1606_v44 }
 0x79a   :  { %v1607_v16 = vmax.f32 %v1604_v45, 0.0 }
 0x79c   :  { %1610 = vst.msk [vmem:[%s2497_s4 + $0x10] sm:$0xff] %vm320_vm2, %v1607_v16 }

</bundles_post_ra>
